<compile_context>
chip_gen: v7x
topology: tpu7x:2x2x1
jax: 0.10.0
libtpu: 0.0.40
codegen_flags: <defaults>
</compile_context>

<pallas_src>
import jax
import jax.numpy as jnp
from jax.experimental import pallas as pl
from jax.experimental.pallas import tpu as pltpu


# ----------------------------- fused network kernel -----------------------------

def _make_lstm_net_kernel(num_layers, Bp, T, H):
    """refs = (x2d_time_major, [w_ih, w_hh, b] * L  (gate cols [i,f,o,g]), fc_w, fc_b, out)."""

    def kernel(*refs):
        x_ref = refs[0]                                     # (T*Bp, D), rows ordered t*Bp + b
        layer_refs = refs[1:1 + 3 * num_layers]
        fc_w_ref = refs[1 + 3 * num_layers]
        fc_b_ref = refs[2 + 3 * num_layers]
        out_ref = refs[3 + 3 * num_layers]

        # Layer-0 input projection hoisted out of the recurrence: one well-shaped MXU matmul
        # over all T*Bp rows, bias (b_ih + b_hh) folded in once.
        xp0 = jnp.dot(x_ref[...], layer_refs[0][...],
                      preferred_element_type=jnp.float32) + layer_refs[2][...]   # (T*Bp, 4H)

        w_hh = [layer_refs[3 * l + 1][...] for l in range(num_layers)]
        w_ih = [None] + [layer_refs[3 * l][...] for l in range(1, num_layers)]
        bias = [None] + [layer_refs[3 * l + 2][...] for l in range(1, num_layers)]

        def cell(gates, c_prev):
            # Gate columns are [i, f, o, g]: sigmoid gates packed contiguous, tanh gate last,
            # so only 3H lanes of sigmoid + H lanes of tanh (+ tanh(c)) hit the EUP per step.
            sig = jax.nn.sigmoid(gates[:, :3 * H])          # (Bp, 3H)
            g = jnp.tanh(gates[:, 3 * H:])                  # (Bp, H)
            i = sig[:, 0:H]
            f = sig[:, H:2 * H]
            o = sig[:, 2 * H:3 * H]
            c_new = f * c_prev + i * g
            h_new = o * jnp.tanh(c_new)
            return h_new, c_new

        h = [jnp.zeros((Bp, H), jnp.float32) for _ in range(num_layers)]
        c = [jnp.zeros((Bp, H), jnp.float32) for _ in range(num_layers)]

        # Wavefront: all layers advance inside one time loop. T is tiny & static -> full unroll
        # (whole DAG visible to the LLO scheduler; the L chains overlap).
        # TODO(synk): for large T switch to lax.fori_loop(..., unroll=k) carrying (h, c) with a
        # VMEM scratch to bound vreg live ranges; for very large H / many layers on v7x (64 MiB
        # VMEM) stream layer weights from HBM with pltpu.make_async_copy instead of full
        # residency, and add a parallel batch grid axis to use the second TensorCore.
        for t in range(T):
            # layer 0: contiguous, sublane-aligned static slice of the hoisted projection.
            gates0 = xp0[t * Bp:(t + 1) * Bp, :] + jnp.dot(
                h[0], w_hh[0], preferred_element_type=jnp.float32)
            h[0], c[0] = cell(gates0, c[0])
            for l in range(1, num_layers):
                gates = (jnp.dot(h[l - 1], w_ih[l], preferred_element_type=jnp.float32)
                         + jnp.dot(h[l], w_hh[l], preferred_element_type=jnp.float32)
                         + bias[l])
                h[l], c[l] = cell(gates, c[l])

        # Fused final Linear on the last timestep's top-layer hidden state (== fc(out[:, -1, :])).
        out_ref[...] = (jnp.dot(h[num_layers - 1], fc_w_ref[...],
                                preferred_element_type=jnp.float32) + fc_b_ref[...])

    return kernel


# ----------------------------------- wrapper -----------------------------------

def lstm_only_last_hidden(x_btd, params):
    """x_btd: (B, T, input_size) batch-first float32  ->  (B, num_classes)."""
    B, T, D = x_btd.shape
    H = params["lstm"][0]["w_hh"].shape[0]
    C = params["fc_w"].shape[1]
    L = len(params["lstm"])

    # Pad batch to sublane granularity (multiple of 8): padded rows are independent garbage.
    Bp = max(8, ((B + 7) // 8) * 8)
    x = x_btd.astype(jnp.float32)
    if Bp != B:
        x = jnp.pad(x, ((0, Bp - B), (0, 0), (0, 0)))
    # Time-major flatten: rows = t*Bp + b  ->  per-timestep slice is contiguous & aligned.
    x2d = jnp.transpose(x, (1, 0, 2)).reshape(T * Bp, D)

    def permute_gates(w):
        # PyTorch gate order [i, f, g, o] -> [i, f, o, g] (sigmoid gates contiguous, tanh last).
        i, f, g, o = jnp.split(w, 4, axis=-1)
        return jnp.concatenate([i, f, o, g], axis=-1)

    flat_w = []
    for lyr in params["lstm"]:
        flat_w += [permute_gates(lyr["w_ih"]),
                   permute_gates(lyr["w_hh"]),
                   permute_gates(lyr["b"])]

    operands = (x2d, *flat_w, params["fc_w"], params["fc_b"])
    n_in = len(operands)

    # Scoped-VMEM limit sized to the real (tiny here) footprint with headroom; on v5e/v6e the
    # default scope (16/32 MiB) is well below physical VMEM for larger H/T configs.
    n_elems = sum(int(op.size) for op in operands) + Bp * C
    vmem_limit = int(min(max(8 * n_elems + (4 << 20), 32 << 20), 64 << 20))

    out = pl.pallas_call(
        _make_lstm_net_kernel(L, Bp, T, H),
        out_shape=jax.ShapeDtypeStruct((Bp, C), jnp.float32),
        in_specs=[pl.BlockSpec(memory_space=pltpu.MemorySpace.VMEM)] * n_in,
        out_specs=pl.BlockSpec(memory_space=pltpu.MemorySpace.VMEM),
        compiler_params=pltpu.CompilerParams(vmem_limit_bytes=vmem_limit),
    )(*operands)
    return out[:B]


# --------------------------- parameter init (PyTorch-style) ---------------------------

def init_params(key, input_size, hidden_size, num_layers, num_classes):
    k = 1.0 / (hidden_size ** 0.5)
    layers = []
    for layer in range(num_layers):
        d_in = input_size if layer == 0 else hidden_size
        key, k1, k2, k3, k4 = jax.random.split(key, 5)
        # Gate order [i, f, g, o] along the 4H axis, matching nn.LSTM.
        w_ih = jax.random.uniform(k1, (d_in, 4 * hidden_size), jnp.float32, -k, k)
        w_hh = jax.random.uniform(k2, (hidden_size, 4 * hidden_size), jnp.float32, -k, k)
        b_ih = jax.random.uniform(k3, (1, 4 * hidden_size), jnp.float32, -k, k)
        b_hh = jax.random.uniform(k4, (1, 4 * hidden_size), jnp.float32, -k, k)
        layers.append({"w_ih": w_ih, "w_hh": w_hh, "b": b_ih + b_hh})
    key, k1, k2 = jax.random.split(key, 3)
    fc_w = jax.random.uniform(k1, (hidden_size, num_classes), jnp.float32, -k, k)
    fc_b = jax.random.uniform(k2, (1, num_classes), jnp.float32, -k, k)
    return {"lstm": layers, "fc_w": fc_w, "fc_b": fc_b}


# ------------------------------- pure-JAX reference -------------------------------

def _hi_dot(a, b):
    return jnp.dot(a, b, precision=jax.lax.Precision.HIGHEST)


def _ref_forward(x_btd, params):
    B, T, _ = x_btd.shape
    seq = x_btd.astype(jnp.float32)                         # (B, T, feat)
    for lyr in params["lstm"]:
        w_ih, w_hh, b = lyr["w_ih"], lyr["w_hh"], lyr["b"]
        H = w_hh.shape[0]

        def step(carry, x_t, w_ih=w_ih, w_hh=w_hh, b=b, H=H):
            h, c = carry
            gates = _hi_dot(x_t, w_ih) + _hi_dot(h, w_hh) + b
            i = jax.nn.sigmoid(gates[:, :H])
            f = jax.nn.sigmoid(gates[:, H:2 * H])
            g = jnp.tanh(gates[:, 2 * H:3 * H])
            o = jax.nn.sigmoid(gates[:, 3 * H:])
            c = f * c + i * g
            h = o * jnp.tanh(c)
            return (h, c), h

        xs = jnp.transpose(seq, (1, 0, 2))                  # (T, B, feat)
        _, hs = jax.lax.scan(step, (jnp.zeros((B, H)), jnp.zeros((B, H))), xs)
        seq = jnp.transpose(hs, (1, 0, 2))                  # (B, T, H)
    return _hi_dot(seq[:, -1, :], params["fc_w"]) + params["fc_b"]


# --------------------------------------- main ---------------------------------------

if __name__ == "__main__":
    B, T = 2, 8
    input_size, hidden_size, num_layers, num_classes = 4, 32, 2, 3

    key = jax.random.PRNGKey(0)
    key, pkey, xkey = jax.random.split(key, 3)
    params = init_params(pkey, input_size, hidden_size, num_layers, num_classes)
    x = jax.random.normal(xkey, (B, T, input_size), jnp.float32)

    fwd = jax.jit(lstm_only_last_hidden)
    out = jax.block_until_ready(fwd(x, params))

    ref = _ref_forward(x, params)
    assert out.shape == (B, num_classes)
    # Kernel dots use default MXU precision; reference uses Precision.HIGHEST -> small slack.
    assert jnp.allclose(out, ref, atol=2e-4, rtol=2e-4), (out, ref)

    # TODO(synk): sample_action's host-side epsilon-greedy / .argmax().item() is Python control
    # logic, not a kernel; it is intentionally left outside the Pallas path.
    print("KERNEL_OK")
</pallas_src>

<mosaic_0001>
module attributes {stable_mosaic.version = 11 : i64} {
  func.func @kernel(%arg0: memref<64x4xf32, #tpu.memory_space<vmem>>, %arg1: memref<4x128xf32, #tpu.memory_space<vmem>>, %arg2: memref<32x128xf32, #tpu.memory_space<vmem>>, %arg3: memref<1x128xf32, #tpu.memory_space<vmem>>, %arg4: memref<32x128xf32, #tpu.memory_space<vmem>>, %arg5: memref<32x128xf32, #tpu.memory_space<vmem>>, %arg6: memref<1x128xf32, #tpu.memory_space<vmem>>, %arg7: memref<32x3xf32, #tpu.memory_space<vmem>>, %arg8: memref<1x3xf32, #tpu.memory_space<vmem>>, %arg9: memref<8x3xf32, #tpu.memory_space<vmem>>) attributes {dimension_semantics = [], scalar_prefetch = 0 : i64, scratch_operands = 0 : i64, tpu.core_type = #tpu.core_type<tc>} {
    %c0 = arith.constant 0 : index
    %c0_0 = arith.constant 0 : index
    %0 = vector.load %arg0[%c0, %c0_0] : memref<64x4xf32, #tpu.memory_space<vmem>>, vector<64x4xf32>
    %c0_1 = arith.constant 0 : index
    %c0_2 = arith.constant 0 : index
    %1 = vector.load %arg1[%c0_1, %c0_2] : memref<4x128xf32, #tpu.memory_space<vmem>>, vector<4x128xf32>
    %cst = arith.constant dense<0.000000e+00> : vector<64x128xf32>
    %2 = tpu.matmul %0, %1, %cst {dimension_numbers = #tpu.dot_dimension_numbers<[1], [0], [0], [1], [0, 0, 1, 1], [], []>} : vector<64x4xf32>, vector<4x128xf32>, vector<64x128xf32> -> vector<64x128xf32>
    %c0_3 = arith.constant 0 : index
    %c0_4 = arith.constant 0 : index
    %3 = vector.load %arg3[%c0_3, %c0_4] : memref<1x128xf32, #tpu.memory_space<vmem>>, vector<1x128xf32>
    %4 = vector.broadcast %3 : vector<1x128xf32> to vector<64x128xf32>
    %5 = arith.addf %2, %4 : vector<64x128xf32>
    %c0_5 = arith.constant 0 : index
    %c0_6 = arith.constant 0 : index
    %6 = vector.load %arg2[%c0_5, %c0_6] : memref<32x128xf32, #tpu.memory_space<vmem>>, vector<32x128xf32>
    %c0_7 = arith.constant 0 : index
    %c0_8 = arith.constant 0 : index
    %7 = vector.load %arg5[%c0_7, %c0_8] : memref<32x128xf32, #tpu.memory_space<vmem>>, vector<32x128xf32>
    %c0_9 = arith.constant 0 : index
    %c0_10 = arith.constant 0 : index
    %8 = vector.load %arg4[%c0_9, %c0_10] : memref<32x128xf32, #tpu.memory_space<vmem>>, vector<32x128xf32>
    %c0_11 = arith.constant 0 : index
    %c0_12 = arith.constant 0 : index
    %9 = vector.load %arg6[%c0_11, %c0_12] : memref<1x128xf32, #tpu.memory_space<vmem>>, vector<1x128xf32>
    %cst_13 = arith.constant 0.000000e+00 : f32
    %10 = vector.broadcast %cst_13 : f32 to vector<8x32xf32>
    %cst_14 = arith.constant 0.000000e+00 : f32
    %11 = vector.broadcast %cst_14 : f32 to vector<8x32xf32>
    %cst_15 = arith.constant 0.000000e+00 : f32
    %12 = vector.broadcast %cst_15 : f32 to vector<8x32xf32>
    %cst_16 = arith.constant 0.000000e+00 : f32
    %13 = vector.broadcast %cst_16 : f32 to vector<8x32xf32>
    %14 = vector.extract_strided_slice %5 {offsets = [0, 0], sizes = [8, 128], strides = [1, 1]} : vector<64x128xf32> to vector<8x128xf32>
    %cst_17 = arith.constant dense<0.000000e+00> : vector<8x128xf32>
    %15 = tpu.matmul %10, %6, %cst_17 {dimension_numbers = #tpu.dot_dimension_numbers<[1], [0], [0], [1], [0, 0, 1, 1], [], []>} : vector<8x32xf32>, vector<32x128xf32>, vector<8x128xf32> -> vector<8x128xf32>
    %16 = arith.addf %14, %15 : vector<8x128xf32>
    %17 = vector.extract_strided_slice %16 {offsets = [0, 0], sizes = [8, 96], strides = [1, 1]} : vector<8x128xf32> to vector<8x96xf32>
    %18 = arith.negf %17 : vector<8x96xf32>
    %19 = math.exp %18 : vector<8x96xf32>
    %cst_18 = arith.constant 1.000000e+00 : f32
    %20 = vector.broadcast %cst_18 : f32 to vector<8x96xf32>
    %21 = arith.addf %20, %19 : vector<8x96xf32>
    %22 = arith.divf %20, %21 : vector<8x96xf32>
    %23 = vector.extract_strided_slice %16 {offsets = [0, 96], sizes = [8, 32], strides = [1, 1]} : vector<8x128xf32> to vector<8x32xf32>
    %24 = math.tanh %23 : vector<8x32xf32>
    %25 = vector.extract_strided_slice %22 {offsets = [0, 0], sizes = [8, 32], strides = [1, 1]} : vector<8x96xf32> to vector<8x32xf32>
    %26 = vector.extract_strided_slice %22 {offsets = [0, 32], sizes = [8, 32], strides = [1, 1]} : vector<8x96xf32> to vector<8x32xf32>
    %27 = vector.extract_strided_slice %22 {offsets = [0, 64], sizes = [8, 32], strides = [1, 1]} : vector<8x96xf32> to vector<8x32xf32>
    %28 = arith.mulf %26, %12 : vector<8x32xf32>
    %29 = arith.mulf %25, %24 : vector<8x32xf32>
    %30 = arith.addf %28, %29 : vector<8x32xf32>
    %31 = math.tanh %30 : vector<8x32xf32>
    %32 = arith.mulf %27, %31 : vector<8x32xf32>
    %cst_19 = arith.constant dense<0.000000e+00> : vector<8x128xf32>
    %33 = tpu.matmul %32, %8, %cst_19 {dimension_numbers = #tpu.dot_dimension_numbers<[1], [0], [0], [1], [0, 0, 1, 1], [], []>} : vector<8x32xf32>, vector<32x128xf32>, vector<8x128xf32> -> vector<8x128xf32>
    %cst_20 = arith.constant dense<0.000000e+00> : vector<8x128xf32>
    %34 = tpu.matmul %11, %7, %cst_20 {dimension_numbers = #tpu.dot_dimension_numbers<[1], [0], [0], [1], [0, 0, 1, 1], [], []>} : vector<8x32xf32>, vector<32x128xf32>, vector<8x128xf32> -> vector<8x128xf32>
    %35 = arith.addf %33, %34 : vector<8x128xf32>
    %36 = vector.broadcast %9 : vector<1x128xf32> to vector<8x128xf32>
    %37 = arith.addf %35, %36 : vector<8x128xf32>
    %38 = vector.extract_strided_slice %37 {offsets = [0, 0], sizes = [8, 96], strides = [1, 1]} : vector<8x128xf32> to vector<8x96xf32>
    %39 = arith.negf %38 : vector<8x96xf32>
    %40 = math.exp %39 : vector<8x96xf32>
    %cst_21 = arith.constant 1.000000e+00 : f32
    %41 = vector.broadcast %cst_21 : f32 to vector<8x96xf32>
    %42 = arith.addf %41, %40 : vector<8x96xf32>
    %43 = arith.divf %41, %42 : vector<8x96xf32>
    %44 = vector.extract_strided_slice %37 {offsets = [0, 96], sizes = [8, 32], strides = [1, 1]} : vector<8x128xf32> to vector<8x32xf32>
    %45 = math.tanh %44 : vector<8x32xf32>
    %46 = vector.extract_strided_slice %43 {offsets = [0, 0], sizes = [8, 32], strides = [1, 1]} : vector<8x96xf32> to vector<8x32xf32>
    %47 = vector.extract_strided_slice %43 {offsets = [0, 32], sizes = [8, 32], strides = [1, 1]} : vector<8x96xf32> to vector<8x32xf32>
    %48 = vector.extract_strided_slice %43 {offsets = [0, 64], sizes = [8, 32], strides = [1, 1]} : vector<8x96xf32> to vector<8x32xf32>
    %49 = arith.mulf %47, %13 : vector<8x32xf32>
    %50 = arith.mulf %46, %45 : vector<8x32xf32>
    %51 = arith.addf %49, %50 : vector<8x32xf32>
    %52 = math.tanh %51 : vector<8x32xf32>
    %53 = arith.mulf %48, %52 : vector<8x32xf32>
    %54 = vector.extract_strided_slice %5 {offsets = [8, 0], sizes = [8, 128], strides = [1, 1]} : vector<64x128xf32> to vector<8x128xf32>
    %cst_22 = arith.constant dense<0.000000e+00> : vector<8x128xf32>
    %55 = tpu.matmul %32, %6, %cst_22 {dimension_numbers = #tpu.dot_dimension_numbers<[1], [0], [0], [1], [0, 0, 1, 1], [], []>} : vector<8x32xf32>, vector<32x128xf32>, vector<8x128xf32> -> vector<8x128xf32>
    %56 = arith.addf %54, %55 : vector<8x128xf32>
    %57 = vector.extract_strided_slice %56 {offsets = [0, 0], sizes = [8, 96], strides = [1, 1]} : vector<8x128xf32> to vector<8x96xf32>
    %58 = arith.negf %57 : vector<8x96xf32>
    %59 = math.exp %58 : vector<8x96xf32>
    %cst_23 = arith.constant 1.000000e+00 : f32
    %60 = vector.broadcast %cst_23 : f32 to vector<8x96xf32>
    %61 = arith.addf %60, %59 : vector<8x96xf32>
    %62 = arith.divf %60, %61 : vector<8x96xf32>
    %63 = vector.extract_strided_slice %56 {offsets = [0, 96], sizes = [8, 32], strides = [1, 1]} : vector<8x128xf32> to vector<8x32xf32>
    %64 = math.tanh %63 : vector<8x32xf32>
    %65 = vector.extract_strided_slice %62 {offsets = [0, 0], sizes = [8, 32], strides = [1, 1]} : vector<8x96xf32> to vector<8x32xf32>
    %66 = vector.extract_strided_slice %62 {offsets = [0, 32], sizes = [8, 32], strides = [1, 1]} : vector<8x96xf32> to vector<8x32xf32>
    %67 = vector.extract_strided_slice %62 {offsets = [0, 64], sizes = [8, 32], strides = [1, 1]} : vector<8x96xf32> to vector<8x32xf32>
    %68 = arith.mulf %66, %30 : vector<8x32xf32>
    %69 = arith.mulf %65, %64 : vector<8x32xf32>
    %70 = arith.addf %68, %69 : vector<8x32xf32>
    %71 = math.tanh %70 : vector<8x32xf32>
    %72 = arith.mulf %67, %71 : vector<8x32xf32>
    %cst_24 = arith.constant dense<0.000000e+00> : vector<8x128xf32>
    %73 = tpu.matmul %72, %8, %cst_24 {dimension_numbers = #tpu.dot_dimension_numbers<[1], [0], [0], [1], [0, 0, 1, 1], [], []>} : vector<8x32xf32>, vector<32x128xf32>, vector<8x128xf32> -> vector<8x128xf32>
    %cst_25 = arith.constant dense<0.000000e+00> : vector<8x128xf32>
    %74 = tpu.matmul %53, %7, %cst_25 {dimension_numbers = #tpu.dot_dimension_numbers<[1], [0], [0], [1], [0, 0, 1, 1], [], []>} : vector<8x32xf32>, vector<32x128xf32>, vector<8x128xf32> -> vector<8x128xf32>
    %75 = arith.addf %73, %74 : vector<8x128xf32>
    %76 = vector.broadcast %9 : vector<1x128xf32> to vector<8x128xf32>
    %77 = arith.addf %75, %76 : vector<8x128xf32>
    %78 = vector.extract_strided_slice %77 {offsets = [0, 0], sizes = [8, 96], strides = [1, 1]} : vector<8x128xf32> to vector<8x96xf32>
    %79 = arith.negf %78 : vector<8x96xf32>
    %80 = math.exp %79 : vector<8x96xf32>
    %cst_26 = arith.constant 1.000000e+00 : f32
    %81 = vector.broadcast %cst_26 : f32 to vector<8x96xf32>
    %82 = arith.addf %81, %80 : vector<8x96xf32>
    %83 = arith.divf %81, %82 : vector<8x96xf32>
    %84 = vector.extract_strided_slice %77 {offsets = [0, 96], sizes = [8, 32], strides = [1, 1]} : vector<8x128xf32> to vector<8x32xf32>
    %85 = math.tanh %84 : vector<8x32xf32>
    %86 = vector.extract_strided_slice %83 {offsets = [0, 0], sizes = [8, 32], strides = [1, 1]} : vector<8x96xf32> to vector<8x32xf32>
    %87 = vector.extract_strided_slice %83 {offsets = [0, 32], sizes = [8, 32], strides = [1, 1]} : vector<8x96xf32> to vector<8x32xf32>
    %88 = vector.extract_strided_slice %83 {offsets = [0, 64], sizes = [8, 32], strides = [1, 1]} : vector<8x96xf32> to vector<8x32xf32>
    %89 = arith.mulf %87, %51 : vector<8x32xf32>
    %90 = arith.mulf %86, %85 : vector<8x32xf32>
    %91 = arith.addf %89, %90 : vector<8x32xf32>
    %92 = math.tanh %91 : vector<8x32xf32>
    %93 = arith.mulf %88, %92 : vector<8x32xf32>
    %94 = vector.extract_strided_slice %5 {offsets = [16, 0], sizes = [8, 128], strides = [1, 1]} : vector<64x128xf32> to vector<8x128xf32>
    %cst_27 = arith.constant dense<0.000000e+00> : vector<8x128xf32>
    %95 = tpu.matmul %72, %6, %cst_27 {dimension_numbers = #tpu.dot_dimension_numbers<[1], [0], [0], [1], [0, 0, 1, 1], [], []>} : vector<8x32xf32>, vector<32x128xf32>, vector<8x128xf32> -> vector<8x128xf32>
    %96 = arith.addf %94, %95 : vector<8x128xf32>
    %97 = vector.extract_strided_slice %96 {offsets = [0, 0], sizes = [8, 96], strides = [1, 1]} : vector<8x128xf32> to vector<8x96xf32>
    %98 = arith.negf %97 : vector<8x96xf32>
    %99 = math.exp %98 : vector<8x96xf32>
    %cst_28 = arith.constant 1.000000e+00 : f32
    %100 = vector.broadcast %cst_28 : f32 to vector<8x96xf32>
    %101 = arith.addf %100, %99 : vector<8x96xf32>
    %102 = arith.divf %100, %101 : vector<8x96xf32>
    %103 = vector.extract_strided_slice %96 {offsets = [0, 96], sizes = [8, 32], strides = [1, 1]} : vector<8x128xf32> to vector<8x32xf32>
    %104 = math.tanh %103 : vector<8x32xf32>
    %105 = vector.extract_strided_slice %102 {offsets = [0, 0], sizes = [8, 32], strides = [1, 1]} : vector<8x96xf32> to vector<8x32xf32>
    %106 = vector.extract_strided_slice %102 {offsets = [0, 32], sizes = [8, 32], strides = [1, 1]} : vector<8x96xf32> to vector<8x32xf32>
    %107 = vector.extract_strided_slice %102 {offsets = [0, 64], sizes = [8, 32], strides = [1, 1]} : vector<8x96xf32> to vector<8x32xf32>
    %108 = arith.mulf %106, %70 : vector<8x32xf32>
    %109 = arith.mulf %105, %104 : vector<8x32xf32>
    %110 = arith.addf %108, %109 : vector<8x32xf32>
    %111 = math.tanh %110 : vector<8x32xf32>
    %112 = arith.mulf %107, %111 : vector<8x32xf32>
    %cst_29 = arith.constant dense<0.000000e+00> : vector<8x128xf32>
    %113 = tpu.matmul %112, %8, %cst_29 {dimension_numbers = #tpu.dot_dimension_numbers<[1], [0], [0], [1], [0, 0, 1, 1], [], []>} : vector<8x32xf32>, vector<32x128xf32>, vector<8x128xf32> -> vector<8x128xf32>
    %cst_30 = arith.constant dense<0.000000e+00> : vector<8x128xf32>
    %114 = tpu.matmul %93, %7, %cst_30 {dimension_numbers = #tpu.dot_dimension_numbers<[1], [0], [0], [1], [0, 0, 1, 1], [], []>} : vector<8x32xf32>, vector<32x128xf32>, vector<8x128xf32> -> vector<8x128xf32>
    %115 = arith.addf %113, %114 : vector<8x128xf32>
    %116 = vector.broadcast %9 : vector<1x128xf32> to vector<8x128xf32>
    %117 = arith.addf %115, %116 : vector<8x128xf32>
    %118 = vector.extract_strided_slice %117 {offsets = [0, 0], sizes = [8, 96], strides = [1, 1]} : vector<8x128xf32> to vector<8x96xf32>
    %119 = arith.negf %118 : vector<8x96xf32>
    %120 = math.exp %119 : vector<8x96xf32>
    %cst_31 = arith.constant 1.000000e+00 : f32
    %121 = vector.broadcast %cst_31 : f32 to vector<8x96xf32>
    %122 = arith.addf %121, %120 : vector<8x96xf32>
    %123 = arith.divf %121, %122 : vector<8x96xf32>
    %124 = vector.extract_strided_slice %117 {offsets = [0, 96], sizes = [8, 32], strides = [1, 1]} : vector<8x128xf32> to vector<8x32xf32>
    %125 = math.tanh %124 : vector<8x32xf32>
    %126 = vector.extract_strided_slice %123 {offsets = [0, 0], sizes = [8, 32], strides = [1, 1]} : vector<8x96xf32> to vector<8x32xf32>
    %127 = vector.extract_strided_slice %123 {offsets = [0, 32], sizes = [8, 32], strides = [1, 1]} : vector<8x96xf32> to vector<8x32xf32>
    %128 = vector.extract_strided_slice %123 {offsets = [0, 64], sizes = [8, 32], strides = [1, 1]} : vector<8x96xf32> to vector<8x32xf32>
    %129 = arith.mulf %127, %91 : vector<8x32xf32>
    %130 = arith.mulf %126, %125 : vector<8x32xf32>
    %131 = arith.addf %129, %130 : vector<8x32xf32>
    %132 = math.tanh %131 : vector<8x32xf32>
    %133 = arith.mulf %128, %132 : vector<8x32xf32>
    %134 = vector.extract_strided_slice %5 {offsets = [24, 0], sizes = [8, 128], strides = [1, 1]} : vector<64x128xf32> to vector<8x128xf32>
    %cst_32 = arith.constant dense<0.000000e+00> : vector<8x128xf32>
    %135 = tpu.matmul %112, %6, %cst_32 {dimension_numbers = #tpu.dot_dimension_numbers<[1], [0], [0], [1], [0, 0, 1, 1], [], []>} : vector<8x32xf32>, vector<32x128xf32>, vector<8x128xf32> -> vector<8x128xf32>
    %136 = arith.addf %134, %135 : vector<8x128xf32>
    %137 = vector.extract_strided_slice %136 {offsets = [0, 0], sizes = [8, 96], strides = [1, 1]} : vector<8x128xf32> to vector<8x96xf32>
    %138 = arith.negf %137 : vector<8x96xf32>
    %139 = math.exp %138 : vector<8x96xf32>
    %cst_33 = arith.constant 1.000000e+00 : f32
    %140 = vector.broadcast %cst_33 : f32 to vector<8x96xf32>
    %141 = arith.addf %140, %139 : vector<8x96xf32>
    %142 = arith.divf %140, %141 : vector<8x96xf32>
    %143 = vector.extract_strided_slice %136 {offsets = [0, 96], sizes = [8, 32], strides = [1, 1]} : vector<8x128xf32> to vector<8x32xf32>
    %144 = math.tanh %143 : vector<8x32xf32>
    %145 = vector.extract_strided_slice %142 {offsets = [0, 0], sizes = [8, 32], strides = [1, 1]} : vector<8x96xf32> to vector<8x32xf32>
    %146 = vector.extract_strided_slice %142 {offsets = [0, 32], sizes = [8, 32], strides = [1, 1]} : vector<8x96xf32> to vector<8x32xf32>
    %147 = vector.extract_strided_slice %142 {offsets = [0, 64], sizes = [8, 32], strides = [1, 1]} : vector<8x96xf32> to vector<8x32xf32>
    %148 = arith.mulf %146, %110 : vector<8x32xf32>
    %149 = arith.mulf %145, %144 : vector<8x32xf32>
    %150 = arith.addf %148, %149 : vector<8x32xf32>
    %151 = math.tanh %150 : vector<8x32xf32>
    %152 = arith.mulf %147, %151 : vector<8x32xf32>
    %cst_34 = arith.constant dense<0.000000e+00> : vector<8x128xf32>
    %153 = tpu.matmul %152, %8, %cst_34 {dimension_numbers = #tpu.dot_dimension_numbers<[1], [0], [0], [1], [0, 0, 1, 1], [], []>} : vector<8x32xf32>, vector<32x128xf32>, vector<8x128xf32> -> vector<8x128xf32>
    %cst_35 = arith.constant dense<0.000000e+00> : vector<8x128xf32>
    %154 = tpu.matmul %133, %7, %cst_35 {dimension_numbers = #tpu.dot_dimension_numbers<[1], [0], [0], [1], [0, 0, 1, 1], [], []>} : vector<8x32xf32>, vector<32x128xf32>, vector<8x128xf32> -> vector<8x128xf32>
    %155 = arith.addf %153, %154 : vector<8x128xf32>
    %156 = vector.broadcast %9 : vector<1x128xf32> to vector<8x128xf32>
    %157 = arith.addf %155, %156 : vector<8x128xf32>
    %158 = vector.extract_strided_slice %157 {offsets = [0, 0], sizes = [8, 96], strides = [1, 1]} : vector<8x128xf32> to vector<8x96xf32>
    %159 = arith.negf %158 : vector<8x96xf32>
    %160 = math.exp %159 : vector<8x96xf32>
    %cst_36 = arith.constant 1.000000e+00 : f32
    %161 = vector.broadcast %cst_36 : f32 to vector<8x96xf32>
    %162 = arith.addf %161, %160 : vector<8x96xf32>
    %163 = arith.divf %161, %162 : vector<8x96xf32>
    %164 = vector.extract_strided_slice %157 {offsets = [0, 96], sizes = [8, 32], strides = [1, 1]} : vector<8x128xf32> to vector<8x32xf32>
    %165 = math.tanh %164 : vector<8x32xf32>
    %166 = vector.extract_strided_slice %163 {offsets = [0, 0], sizes = [8, 32], strides = [1, 1]} : vector<8x96xf32> to vector<8x32xf32>
    %167 = vector.extract_strided_slice %163 {offsets = [0, 32], sizes = [8, 32], strides = [1, 1]} : vector<8x96xf32> to vector<8x32xf32>
    %168 = vector.extract_strided_slice %163 {offsets = [0, 64], sizes = [8, 32], strides = [1, 1]} : vector<8x96xf32> to vector<8x32xf32>
    %169 = arith.mulf %167, %131 : vector<8x32xf32>
    %170 = arith.mulf %166, %165 : vector<8x32xf32>
    %171 = arith.addf %169, %170 : vector<8x32xf32>
    %172 = math.tanh %171 : vector<8x32xf32>
    %173 = arith.mulf %168, %172 : vector<8x32xf32>
    %174 = vector.extract_strided_slice %5 {offsets = [32, 0], sizes = [8, 128], strides = [1, 1]} : vector<64x128xf32> to vector<8x128xf32>
    %cst_37 = arith.constant dense<0.000000e+00> : vector<8x128xf32>
    %175 = tpu.matmul %152, %6, %cst_37 {dimension_numbers = #tpu.dot_dimension_numbers<[1], [0], [0], [1], [0, 0, 1, 1], [], []>} : vector<8x32xf32>, vector<32x128xf32>, vector<8x128xf32> -> vector<8x128xf32>
    %176 = arith.addf %174, %175 : vector<8x128xf32>
    %177 = vector.extract_strided_slice %176 {offsets = [0, 0], sizes = [8, 96], strides = [1, 1]} : vector<8x128xf32> to vector<8x96xf32>
    %178 = arith.negf %177 : vector<8x96xf32>
    %179 = math.exp %178 : vector<8x96xf32>
    %cst_38 = arith.constant 1.000000e+00 : f32
    %180 = vector.broadcast %cst_38 : f32 to vector<8x96xf32>
    %181 = arith.addf %180, %179 : vector<8x96xf32>
    %182 = arith.divf %180, %181 : vector<8x96xf32>
    %183 = vector.extract_strided_slice %176 {offsets = [0, 96], sizes = [8, 32], strides = [1, 1]} : vector<8x128xf32> to vector<8x32xf32>
    %184 = math.tanh %183 : vector<8x32xf32>
    %185 = vector.extract_strided_slice %182 {offsets = [0, 0], sizes = [8, 32], strides = [1, 1]} : vector<8x96xf32> to vector<8x32xf32>
    %186 = vector.extract_strided_slice %182 {offsets = [0, 32], sizes = [8, 32], strides = [1, 1]} : vector<8x96xf32> to vector<8x32xf32>
    %187 = vector.extract_strided_slice %182 {offsets = [0, 64], sizes = [8, 32], strides = [1, 1]} : vector<8x96xf32> to vector<8x32xf32>
    %188 = arith.mulf %186, %150 : vector<8x32xf32>
    %189 = arith.mulf %185, %184 : vector<8x32xf32>
    %190 = arith.addf %188, %189 : vector<8x32xf32>
    %191 = math.tanh %190 : vector<8x32xf32>
    %192 = arith.mulf %187, %191 : vector<8x32xf32>
    %cst_39 = arith.constant dense<0.000000e+00> : vector<8x128xf32>
    %193 = tpu.matmul %192, %8, %cst_39 {dimension_numbers = #tpu.dot_dimension_numbers<[1], [0], [0], [1], [0, 0, 1, 1], [], []>} : vector<8x32xf32>, vector<32x128xf32>, vector<8x128xf32> -> vector<8x128xf32>
    %cst_40 = arith.constant dense<0.000000e+00> : vector<8x128xf32>
    %194 = tpu.matmul %173, %7, %cst_40 {dimension_numbers = #tpu.dot_dimension_numbers<[1], [0], [0], [1], [0, 0, 1, 1], [], []>} : vector<8x32xf32>, vector<32x128xf32>, vector<8x128xf32> -> vector<8x128xf32>
    %195 = arith.addf %193, %194 : vector<8x128xf32>
    %196 = vector.broadcast %9 : vector<1x128xf32> to vector<8x128xf32>
    %197 = arith.addf %195, %196 : vector<8x128xf32>
    %198 = vector.extract_strided_slice %197 {offsets = [0, 0], sizes = [8, 96], strides = [1, 1]} : vector<8x128xf32> to vector<8x96xf32>
    %199 = arith.negf %198 : vector<8x96xf32>
    %200 = math.exp %199 : vector<8x96xf32>
    %cst_41 = arith.constant 1.000000e+00 : f32
    %201 = vector.broadcast %cst_41 : f32 to vector<8x96xf32>
    %202 = arith.addf %201, %200 : vector<8x96xf32>
    %203 = arith.divf %201, %202 : vector<8x96xf32>
    %204 = vector.extract_strided_slice %197 {offsets = [0, 96], sizes = [8, 32], strides = [1, 1]} : vector<8x128xf32> to vector<8x32xf32>
    %205 = math.tanh %204 : vector<8x32xf32>
    %206 = vector.extract_strided_slice %203 {offsets = [0, 0], sizes = [8, 32], strides = [1, 1]} : vector<8x96xf32> to vector<8x32xf32>
    %207 = vector.extract_strided_slice %203 {offsets = [0, 32], sizes = [8, 32], strides = [1, 1]} : vector<8x96xf32> to vector<8x32xf32>
    %208 = vector.extract_strided_slice %203 {offsets = [0, 64], sizes = [8, 32], strides = [1, 1]} : vector<8x96xf32> to vector<8x32xf32>
    %209 = arith.mulf %207, %171 : vector<8x32xf32>
    %210 = arith.mulf %206, %205 : vector<8x32xf32>
    %211 = arith.addf %209, %210 : vector<8x32xf32>
    %212 = math.tanh %211 : vector<8x32xf32>
    %213 = arith.mulf %208, %212 : vector<8x32xf32>
    %214 = vector.extract_strided_slice %5 {offsets = [40, 0], sizes = [8, 128], strides = [1, 1]} : vector<64x128xf32> to vector<8x128xf32>
    %cst_42 = arith.constant dense<0.000000e+00> : vector<8x128xf32>
    %215 = tpu.matmul %192, %6, %cst_42 {dimension_numbers = #tpu.dot_dimension_numbers<[1], [0], [0], [1], [0, 0, 1, 1], [], []>} : vector<8x32xf32>, vector<32x128xf32>, vector<8x128xf32> -> vector<8x128xf32>
    %216 = arith.addf %214, %215 : vector<8x128xf32>
    %217 = vector.extract_strided_slice %216 {offsets = [0, 0], sizes = [8, 96], strides = [1, 1]} : vector<8x128xf32> to vector<8x96xf32>
    %218 = arith.negf %217 : vector<8x96xf32>
    %219 = math.exp %218 : vector<8x96xf32>
    %cst_43 = arith.constant 1.000000e+00 : f32
    %220 = vector.broadcast %cst_43 : f32 to vector<8x96xf32>
    %221 = arith.addf %220, %219 : vector<8x96xf32>
    %222 = arith.divf %220, %221 : vector<8x96xf32>
    %223 = vector.extract_strided_slice %216 {offsets = [0, 96], sizes = [8, 32], strides = [1, 1]} : vector<8x128xf32> to vector<8x32xf32>
    %224 = math.tanh %223 : vector<8x32xf32>
    %225 = vector.extract_strided_slice %222 {offsets = [0, 0], sizes = [8, 32], strides = [1, 1]} : vector<8x96xf32> to vector<8x32xf32>
    %226 = vector.extract_strided_slice %222 {offsets = [0, 32], sizes = [8, 32], strides = [1, 1]} : vector<8x96xf32> to vector<8x32xf32>
    %227 = vector.extract_strided_slice %222 {offsets = [0, 64], sizes = [8, 32], strides = [1, 1]} : vector<8x96xf32> to vector<8x32xf32>
    %228 = arith.mulf %226, %190 : vector<8x32xf32>
    %229 = arith.mulf %225, %224 : vector<8x32xf32>
    %230 = arith.addf %228, %229 : vector<8x32xf32>
    %231 = math.tanh %230 : vector<8x32xf32>
    %232 = arith.mulf %227, %231 : vector<8x32xf32>
    %cst_44 = arith.constant dense<0.000000e+00> : vector<8x128xf32>
    %233 = tpu.matmul %232, %8, %cst_44 {dimension_numbers = #tpu.dot_dimension_numbers<[1], [0], [0], [1], [0, 0, 1, 1], [], []>} : vector<8x32xf32>, vector<32x128xf32>, vector<8x128xf32> -> vector<8x128xf32>
    %cst_45 = arith.constant dense<0.000000e+00> : vector<8x128xf32>
    %234 = tpu.matmul %213, %7, %cst_45 {dimension_numbers = #tpu.dot_dimension_numbers<[1], [0], [0], [1], [0, 0, 1, 1], [], []>} : vector<8x32xf32>, vector<32x128xf32>, vector<8x128xf32> -> vector<8x128xf32>
    %235 = arith.addf %233, %234 : vector<8x128xf32>
    %236 = vector.broadcast %9 : vector<1x128xf32> to vector<8x128xf32>
    %237 = arith.addf %235, %236 : vector<8x128xf32>
    %238 = vector.extract_strided_slice %237 {offsets = [0, 0], sizes = [8, 96], strides = [1, 1]} : vector<8x128xf32> to vector<8x96xf32>
    %239 = arith.negf %238 : vector<8x96xf32>
    %240 = math.exp %239 : vector<8x96xf32>
    %cst_46 = arith.constant 1.000000e+00 : f32
    %241 = vector.broadcast %cst_46 : f32 to vector<8x96xf32>
    %242 = arith.addf %241, %240 : vector<8x96xf32>
    %243 = arith.divf %241, %242 : vector<8x96xf32>
    %244 = vector.extract_strided_slice %237 {offsets = [0, 96], sizes = [8, 32], strides = [1, 1]} : vector<8x128xf32> to vector<8x32xf32>
    %245 = math.tanh %244 : vector<8x32xf32>
    %246 = vector.extract_strided_slice %243 {offsets = [0, 0], sizes = [8, 32], strides = [1, 1]} : vector<8x96xf32> to vector<8x32xf32>
    %247 = vector.extract_strided_slice %243 {offsets = [0, 32], sizes = [8, 32], strides = [1, 1]} : vector<8x96xf32> to vector<8x32xf32>
    %248 = vector.extract_strided_slice %243 {offsets = [0, 64], sizes = [8, 32], strides = [1, 1]} : vector<8x96xf32> to vector<8x32xf32>
    %249 = arith.mulf %247, %211 : vector<8x32xf32>
    %250 = arith.mulf %246, %245 : vector<8x32xf32>
    %251 = arith.addf %249, %250 : vector<8x32xf32>
    %252 = math.tanh %251 : vector<8x32xf32>
    %253 = arith.mulf %248, %252 : vector<8x32xf32>
    %254 = vector.extract_strided_slice %5 {offsets = [48, 0], sizes = [8, 128], strides = [1, 1]} : vector<64x128xf32> to vector<8x128xf32>
    %cst_47 = arith.constant dense<0.000000e+00> : vector<8x128xf32>
    %255 = tpu.matmul %232, %6, %cst_47 {dimension_numbers = #tpu.dot_dimension_numbers<[1], [0], [0], [1], [0, 0, 1, 1], [], []>} : vector<8x32xf32>, vector<32x128xf32>, vector<8x128xf32> -> vector<8x128xf32>
    %256 = arith.addf %254, %255 : vector<8x128xf32>
    %257 = vector.extract_strided_slice %256 {offsets = [0, 0], sizes = [8, 96], strides = [1, 1]} : vector<8x128xf32> to vector<8x96xf32>
    %258 = arith.negf %257 : vector<8x96xf32>
    %259 = math.exp %258 : vector<8x96xf32>
    %cst_48 = arith.constant 1.000000e+00 : f32
    %260 = vector.broadcast %cst_48 : f32 to vector<8x96xf32>
    %261 = arith.addf %260, %259 : vector<8x96xf32>
    %262 = arith.divf %260, %261 : vector<8x96xf32>
    %263 = vector.extract_strided_slice %256 {offsets = [0, 96], sizes = [8, 32], strides = [1, 1]} : vector<8x128xf32> to vector<8x32xf32>
    %264 = math.tanh %263 : vector<8x32xf32>
    %265 = vector.extract_strided_slice %262 {offsets = [0, 0], sizes = [8, 32], strides = [1, 1]} : vector<8x96xf32> to vector<8x32xf32>
    %266 = vector.extract_strided_slice %262 {offsets = [0, 32], sizes = [8, 32], strides = [1, 1]} : vector<8x96xf32> to vector<8x32xf32>
    %267 = vector.extract_strided_slice %262 {offsets = [0, 64], sizes = [8, 32], strides = [1, 1]} : vector<8x96xf32> to vector<8x32xf32>
    %268 = arith.mulf %266, %230 : vector<8x32xf32>
    %269 = arith.mulf %265, %264 : vector<8x32xf32>
    %270 = arith.addf %268, %269 : vector<8x32xf32>
    %271 = math.tanh %270 : vector<8x32xf32>
    %272 = arith.mulf %267, %271 : vector<8x32xf32>
    %cst_49 = arith.constant dense<0.000000e+00> : vector<8x128xf32>
    %273 = tpu.matmul %272, %8, %cst_49 {dimension_numbers = #tpu.dot_dimension_numbers<[1], [0], [0], [1], [0, 0, 1, 1], [], []>} : vector<8x32xf32>, vector<32x128xf32>, vector<8x128xf32> -> vector<8x128xf32>
    %cst_50 = arith.constant dense<0.000000e+00> : vector<8x128xf32>
    %274 = tpu.matmul %253, %7, %cst_50 {dimension_numbers = #tpu.dot_dimension_numbers<[1], [0], [0], [1], [0, 0, 1, 1], [], []>} : vector<8x32xf32>, vector<32x128xf32>, vector<8x128xf32> -> vector<8x128xf32>
    %275 = arith.addf %273, %274 : vector<8x128xf32>
    %276 = vector.broadcast %9 : vector<1x128xf32> to vector<8x128xf32>
    %277 = arith.addf %275, %276 : vector<8x128xf32>
    %278 = vector.extract_strided_slice %277 {offsets = [0, 0], sizes = [8, 96], strides = [1, 1]} : vector<8x128xf32> to vector<8x96xf32>
    %279 = arith.negf %278 : vector<8x96xf32>
    %280 = math.exp %279 : vector<8x96xf32>
    %cst_51 = arith.constant 1.000000e+00 : f32
    %281 = vector.broadcast %cst_51 : f32 to vector<8x96xf32>
    %282 = arith.addf %281, %280 : vector<8x96xf32>
    %283 = arith.divf %281, %282 : vector<8x96xf32>
    %284 = vector.extract_strided_slice %277 {offsets = [0, 96], sizes = [8, 32], strides = [1, 1]} : vector<8x128xf32> to vector<8x32xf32>
    %285 = math.tanh %284 : vector<8x32xf32>
    %286 = vector.extract_strided_slice %283 {offsets = [0, 0], sizes = [8, 32], strides = [1, 1]} : vector<8x96xf32> to vector<8x32xf32>
    %287 = vector.extract_strided_slice %283 {offsets = [0, 32], sizes = [8, 32], strides = [1, 1]} : vector<8x96xf32> to vector<8x32xf32>
    %288 = vector.extract_strided_slice %283 {offsets = [0, 64], sizes = [8, 32], strides = [1, 1]} : vector<8x96xf32> to vector<8x32xf32>
    %289 = arith.mulf %287, %251 : vector<8x32xf32>
    %290 = arith.mulf %286, %285 : vector<8x32xf32>
    %291 = arith.addf %289, %290 : vector<8x32xf32>
    %292 = math.tanh %291 : vector<8x32xf32>
    %293 = arith.mulf %288, %292 : vector<8x32xf32>
    %294 = vector.extract_strided_slice %5 {offsets = [56, 0], sizes = [8, 128], strides = [1, 1]} : vector<64x128xf32> to vector<8x128xf32>
    %cst_52 = arith.constant dense<0.000000e+00> : vector<8x128xf32>
    %295 = tpu.matmul %272, %6, %cst_52 {dimension_numbers = #tpu.dot_dimension_numbers<[1], [0], [0], [1], [0, 0, 1, 1], [], []>} : vector<8x32xf32>, vector<32x128xf32>, vector<8x128xf32> -> vector<8x128xf32>
    %296 = arith.addf %294, %295 : vector<8x128xf32>
    %297 = vector.extract_strided_slice %296 {offsets = [0, 0], sizes = [8, 96], strides = [1, 1]} : vector<8x128xf32> to vector<8x96xf32>
    %298 = arith.negf %297 : vector<8x96xf32>
    %299 = math.exp %298 : vector<8x96xf32>
    %cst_53 = arith.constant 1.000000e+00 : f32
    %300 = vector.broadcast %cst_53 : f32 to vector<8x96xf32>
    %301 = arith.addf %300, %299 : vector<8x96xf32>
    %302 = arith.divf %300, %301 : vector<8x96xf32>
    %303 = vector.extract_strided_slice %296 {offsets = [0, 96], sizes = [8, 32], strides = [1, 1]} : vector<8x128xf32> to vector<8x32xf32>
    %304 = math.tanh %303 : vector<8x32xf32>
    %305 = vector.extract_strided_slice %302 {offsets = [0, 0], sizes = [8, 32], strides = [1, 1]} : vector<8x96xf32> to vector<8x32xf32>
    %306 = vector.extract_strided_slice %302 {offsets = [0, 32], sizes = [8, 32], strides = [1, 1]} : vector<8x96xf32> to vector<8x32xf32>
    %307 = vector.extract_strided_slice %302 {offsets = [0, 64], sizes = [8, 32], strides = [1, 1]} : vector<8x96xf32> to vector<8x32xf32>
    %308 = arith.mulf %306, %270 : vector<8x32xf32>
    %309 = arith.mulf %305, %304 : vector<8x32xf32>
    %310 = arith.addf %308, %309 : vector<8x32xf32>
    %311 = math.tanh %310 : vector<8x32xf32>
    %312 = arith.mulf %307, %311 : vector<8x32xf32>
    %cst_54 = arith.constant dense<0.000000e+00> : vector<8x128xf32>
    %313 = tpu.matmul %312, %8, %cst_54 {dimension_numbers = #tpu.dot_dimension_numbers<[1], [0], [0], [1], [0, 0, 1, 1], [], []>} : vector<8x32xf32>, vector<32x128xf32>, vector<8x128xf32> -> vector<8x128xf32>
    %cst_55 = arith.constant dense<0.000000e+00> : vector<8x128xf32>
    %314 = tpu.matmul %293, %7, %cst_55 {dimension_numbers = #tpu.dot_dimension_numbers<[1], [0], [0], [1], [0, 0, 1, 1], [], []>} : vector<8x32xf32>, vector<32x128xf32>, vector<8x128xf32> -> vector<8x128xf32>
    %315 = arith.addf %313, %314 : vector<8x128xf32>
    %316 = vector.broadcast %9 : vector<1x128xf32> to vector<8x128xf32>
    %317 = arith.addf %315, %316 : vector<8x128xf32>
    %318 = vector.extract_strided_slice %317 {offsets = [0, 0], sizes = [8, 96], strides = [1, 1]} : vector<8x128xf32> to vector<8x96xf32>
    %319 = arith.negf %318 : vector<8x96xf32>
    %320 = math.exp %319 : vector<8x96xf32>
    %cst_56 = arith.constant 1.000000e+00 : f32
    %321 = vector.broadcast %cst_56 : f32 to vector<8x96xf32>
    %322 = arith.addf %321, %320 : vector<8x96xf32>
    %323 = arith.divf %321, %322 : vector<8x96xf32>
    %324 = vector.extract_strided_slice %317 {offsets = [0, 96], sizes = [8, 32], strides = [1, 1]} : vector<8x128xf32> to vector<8x32xf32>
    %325 = math.tanh %324 : vector<8x32xf32>
    %326 = vector.extract_strided_slice %323 {offsets = [0, 0], sizes = [8, 32], strides = [1, 1]} : vector<8x96xf32> to vector<8x32xf32>
    %327 = vector.extract_strided_slice %323 {offsets = [0, 32], sizes = [8, 32], strides = [1, 1]} : vector<8x96xf32> to vector<8x32xf32>
    %328 = vector.extract_strided_slice %323 {offsets = [0, 64], sizes = [8, 32], strides = [1, 1]} : vector<8x96xf32> to vector<8x32xf32>
    %329 = arith.mulf %327, %291 : vector<8x32xf32>
    %330 = arith.mulf %326, %325 : vector<8x32xf32>
    %331 = arith.addf %329, %330 : vector<8x32xf32>
    %332 = math.tanh %331 : vector<8x32xf32>
    %333 = arith.mulf %328, %332 : vector<8x32xf32>
    %c0_57 = arith.constant 0 : index
    %c0_58 = arith.constant 0 : index
    %334 = vector.load %arg7[%c0_57, %c0_58] : memref<32x3xf32, #tpu.memory_space<vmem>>, vector<32x3xf32>
    %cst_59 = arith.constant dense<0.000000e+00> : vector<8x3xf32>
    %335 = tpu.matmul %333, %334, %cst_59 {dimension_numbers = #tpu.dot_dimension_numbers<[1], [0], [0], [1], [0, 0, 1, 1], [], []>} : vector<8x32xf32>, vector<32x3xf32>, vector<8x3xf32> -> vector<8x3xf32>
    %c0_60 = arith.constant 0 : index
    %c0_61 = arith.constant 0 : index
    %336 = vector.load %arg8[%c0_60, %c0_61] : memref<1x3xf32, #tpu.memory_space<vmem>>, vector<1x3xf32>
    %337 = vector.broadcast %336 : vector<1x3xf32> to vector<8x3xf32>
    %338 = arith.addf %335, %337 : vector<8x3xf32>
    %c0_62 = arith.constant 0 : index
    %c0_63 = arith.constant 0 : index
    %339 = vector.load %arg9[%c0_62, %c0_63] : memref<8x3xf32, #tpu.memory_space<vmem>>, vector<8x3xf32>
    tpu.vector_store %arg9[%c0_62, %c0_63], %338 {strides = array<i32>} : memref<8x3xf32, #tpu.memory_space<vmem>>, vector<8x3xf32>,
    return
  }
}

</mosaic_0001>

<bundles_post_ra>
// kernel: lstm_only_last_hidden.1
= control target key start
LH: loop header
LB: loop body
LE: loop exit
PB: predicated region body
PF: predicated region fallthrough
CT: control target
= control target key end

     0   :  { %vm73_vm0 = vcmask 1043456   ;;  %vm48_vm1 = vcmask 31744   ;;  %v3210_v0 = vmov 0.0|0.0   ;;  %vm3211_vm2 = vmmov 0   ;;  %s3213_s23 = smov 32   ;;  %s3706_s2 = inlined_call_operand.vmem [shape: f32[32,128], index: 2, kind: input, shape index: {}]   ;;  %s3707_s1 = inlined_call_operand.vmem [shape: f32[4,128], index: 1, kind: input, shape index: {}]   ;;  %s3708_s0 = inlined_call_operand.vmem [shape: f32[64,4], index: 0, kind: input, shape index: {}]   ;;  %s3709_s3 = inlined_call_operand.vmem [shape: f32[1,128], index: 3, kind: input, shape index: {}]   ;;  %s3710_s4 = inlined_call_operand.vmem [shape: f32[32,128], index: 4, kind: input, shape index: {}]   ;;  %s3711_s5 = inlined_call_operand.vmem [shape: f32[32,128], index: 5, kind: input, shape index: {}]   ;;  %s3712_s6 = inlined_call_operand.vmem [shape: f32[1,128], index: 6, kind: input, shape index: {}]   ;;  %s3713_s7 = inlined_call_operand.vmem [shape: f32[32,3], index: 7, kind: input, shape index: {}]   ;;  %s3714_s8 = inlined_call_operand.vmem [shape: f32[1,3], index: 8, kind: input, shape index: {}]   ;;  %s3715_s9 = inlined_call_operand.vmem [shape: f32[8,3], index: 9, kind: output, shape index: {}]  }
   0x1   :  { %2926 = vmatprep.subr.bf16.mxu1 %v3210_v0  ;;  %v182_v1 = vld [vmem:[%s3706_s2] sm:$0xff]  ;;  %v183_v2 = vld [vmem:[%s3706_s2 + $0x8] sm:$0xff]  ;;  %v184_v7 = vld [vmem:[%s3706_s2 + $0x10] sm:$0xff]  ;;  %v3212_v8 = vmov 0.0   ;;  %vm195_vm3 = vcmask 261120   ;;  %vm2446_vm4 = vcmask 23552  }
   0x2   :  { %v40_v3 = vld [vmem:[%s3707_s1] sm:$0xf]  ;;  %v3275_v4 = vpack.c.bf16 %v183_v2, %v182_v1  ;;  %v33_v6 = vld [vmem:[%s3708_s0 + $0x8] sm:$0xff]  ;;  %2659 = vmatprep.mubr.msk.f32.mxu1 %vm3211_vm2, %v3212_v8  ;;  %v185_v9 = vld [vmem:[%s3706_s2 + $0x18] sm:$0xff] }
   0x3   :  { %2637 = vmatprep.subr.msk.mxu0 %vm73_vm0, %v40_v3  ;;  %v32_v5 = vld [vmem:[%s3708_s0] sm:$0xff]  ;;  %v3296_v10 = vpack.c.bf16 %v185_v9, %v184_v7  ;;  %v34_v28 = vld [vmem:[%s3708_s0 + $0x10] sm:$0xff]  ;;  %v35_v29 = vld [vmem:[%s3708_s0 + $0x18] sm:$0xff] }
   0x4   :  { %2638 = vmatpush3.msk.msra.mxu0 %vm73_vm0, %v40_v3  ;;  %2639 = vmatprep.mubr.msk.f32.mxu0 %vm48_vm1, %v32_v5  ;;  %v3310_v12 = vld [vmem:[%s3709_s3] ss:$0 sm:$0xff]  ;;  %v191_v32 = vld [vmem:[%s3710_s4 + $0x8] sm:$0xff]  ;;  %v188_v36 = vld [vmem:[%s3711_s5 + $0x10] sm:$0xff] }
   0x5   :  { %2928 = vmatpush3.bf16.msra.mxu1 %v3275_v4  ;;  %2640 = vmatmul.mubr.msk.f32.vlgmr.msra.gmra.mrb[0].mxu0 %vm48_vm1, %v33_v6  ;;  %v36_v30 = vld [vmem:[%s3708_s0 + $0x20] sm:$0xff]  ;;  %v187_v35 = vld [vmem:[%s3711_s5 + $0x8] sm:$0xff]  ;;  %v189_v37 = vld [vmem:[%s3711_s5 + $0x18] sm:$0xff] }
   0x6   :  { %2929 = vmatprep.subr.bf16.mxu1 %v3210_v0  ;;  %2938 = vmatprep.subr.bf16.mxu0 %v3210_v0  ;;  %v190_v31 = vld [vmem:[%s3710_s4] sm:$0xff]  ;;  %v37_v39 = vld [vmem:[%s3708_s0 + $0x28] sm:$0xff]  ;;  %v192_v40 = vld [vmem:[%s3710_s4 + $0x10] sm:$0xff]  ;;  %v3368_v44 = vpack.c.bf16 %v189_v37, %v188_v36 }
   0x7   :  { %v186_v33 = vld [vmem:[%s3711_s5] sm:$0xff]  ;;  %2642 = vmatprep.mubr.msk.f32.mxu0 %vm48_vm1, %v34_v28  ;;  %v3337_v34 = vpack.c.bf16 %v191_v32, %v190_v31  ;;  %v193_v41 = vld [vmem:[%s3710_s4 + $0x18] sm:$0xff]  ;;  %v38_v43 = vld [vmem:[%s3708_s0 + $0x30] sm:$0xff] }
   0x8   :  { %v3349_v38 = vpack.c.bf16 %v187_v35, %v186_v33  ;;  %v3362_v42 = vpack.c.bf16 %v193_v41, %v192_v40  ;;  %v39_v45 = vld [vmem:[%s3708_s0 + $0x38] sm:$0xff]  ;;  %s3214_s0 = smov 64   ;;  %v3424_v59 = vld [vmem:[%s3712_s6] ss:$0 sm:$0xff] }
   0x9   :  { %2931 = vmatpush3.bf16.msra.mxu1 %v3296_v10  ;;  %2643 = vmatmul.mubr.msk.f32.gmra.mrb[2].mxu0 %vm48_vm1, %v35_v29 }
   0xa   :  { %2932 = vmatprep.subr.bf16.mxu1 %v3210_v0  ;;  %2645 = vmatprep.mubr.msk.f32.mxu0 %vm48_vm1, %v36_v30 }
   0xb   :  { %2940 = vmatpush3.bf16.msra.mxu0 %v3337_v34 }
   0xc   :  { %2660 = vmatmul.mubr.f32.vlgmr.msra.gmra.mrb[0].mxu1 %v3212_v8  ;;  %2941 = vmatprep.subr.bf16.mxu0 %v3210_v0 }
   0xd   :  { %2670 = vmatprep.mubr.msk.f32.mxu1 %vm3211_vm2, %v3212_v8  ;;  %2934 = vmatpush3.bf16.msra.mxu1 %v3349_v38 }
   0xe   :  { %2935 = vmatprep.subr.bf16.mxu1 %v3210_v0  ;;  %2646 = vmatmul.mubr.msk.f32.gmra.mrb[4].mxu0 %vm48_vm1, %v37_v39 }
   0xf   :  { %2648 = vmatprep.mubr.msk.f32.mxu0 %vm48_vm1, %v38_v43  ;;  %2943 = vmatpush3.bf16.msra.mxu0 %v3362_v42 }
  0x10   :  { %2950 = vmatprep.subr.bf16.mxu0 %v3210_v0 }
  0x11   :  { %2937 = vmatpush3.bf16.msra.mxu1 %v3368_v44 }
  0x12   :  { %2944 = vmatprep.subr.bf16.mxu1 %v3210_v0  ;;  %2649 = vmatmul.mubr.msk.f32.gmra.mrb[6].mxu0 %vm48_vm1, %v39_v45 }
  0x13   :  { %2681 = vmatprep.mubr.msk.f32.mxu0 %vm3211_vm2, %v3212_v8 }
  0x14   :  { %2671 = vmatmul.mubr.f32.vlgmr.msra.gmra.mrb[2].mxu1 %v3212_v8 }
  0x15   :  { %2946 = vmatpush3.bf16.msra.mxu1 %v3275_v4  ;;  %2692 = vmatprep.mubr.msk.f32.mxu1 %vm3211_vm2, %v3212_v8 }
  0x16   :  { %2947 = vmatprep.subr.bf16.mxu1 %v3210_v0 }
  0x19   :  { %2949 = vmatpush3.bf16.msra.mxu1 %v3296_v10 }
  0x1a   :  { %2956 = vmatprep.subr.bf16.mxu1 %v3210_v0 }
  0xd8   :  { %v3305_v11 = vpop.f32.mrb[0].mxu0 }
  0xd9   :  { %v143_v13 = vpop.f32.mrb[1].mxu0  ;;  %v149_v58 = vadd.f32 %v3305_v11, %v3310_v12 }
  0xda   :  { %v144_v14 = vadd.f32 %v3310_v12, %v143_v13 }
  0xdc   :  { %v3393_v49 = vpop.f32.mrb[2].mxu0 }
  0xdd   :  { %v3395_v50 = vpop.f32.mrb[3].mxu0 }
  0xdf   :  { %v265_v15 = vpop.f32.mrb[0].mxu1 }
  0xe0   :  { %v269_v16 = vadd.f32 %v265_v15, %v144_v14  ;;  %v2661_v17 = vpop.f32.mrb[1].mxu1 }
  0xe1   :  { %v3397_v51 = vpop.f32.mrb[4].mxu0 }
  0xe2   :  { %3081 = vtanh.f32 %v269_v16  ;;  %v2462_v19 = vmul.f32 -1.442695, %v269_v16  ;;  %v3399_v52 = vpop.f32.mrb[5].mxu0 }
  0xe4   :  { %3083 = vpow2.f32 %v2462_v19 }
  0xe5   :  { %v3401_v53 = vpop.f32.mrb[6].mxu0 }
  0xe6   :  { %v3403_v54 = vpop.f32.mrb[7].mxu0 }
  0xe7   :  { %v360_v55 = vpop.f32.mrb[2].mxu1 }
  0xe8   :  { %v2672_v56 = vpop.f32.mrb[3].mxu1 }
  0xec   :  { %v3082_v18 = vpop.eup %3081 }
  0xed   :  { %279 = vrot.lane.b32.xlu0 %v3082_v18, %s3213_s23 }
  0xee   :  { %v3084_v20 = vpop.eup %3083 }
  0xef   :  { %v273_v21 = vadd.f32 1.0, %v3084_v20 }
  0xf1   :  { %3085 = vrcp.f32 %v273_v21 }
  0xfb   :  { %v3086_v22 = vpop.eup %3085 }
  0xfc   :  { %v277_v25 = vmul.f32 0.0, %v3086_v22 }
 0x15f   :  { %v280_v23 = vpop.permute.xlu0 %279 }
 0x160   :  { %v282_v24 = vmul.f32 %v3086_v22, %v280_v23 }
 0x162   :  { %284 = vrot.lane.b32.xlu0 %v282_v24, %s3213_s23 }
 0x1d4   :  { %v285_v26 = vpop.permute.xlu0 %284 }
 0x1d5   :  { %v3315_v27 = vadd.f32 %v285_v26, %v277_v25 }
 0x1d7   :  { %3087 = vtanh.f32 %v3315_v27 }
 0x1e1   :  { %v3088_v46 = vpop.eup %3087 }
 0x1e2   :  { %290 = vrot.lane.b32.xlu1 %v3088_v46, %s3213_s23  ;;  %v154_v46 = vadd.f32 %v3310_v12, %v3395_v50 }
 0x254   :  { %v291_v47 = vpop.permute.xlu1 %290 }
 0x255   :  { %v293_v48 = vmul.f32 %v3086_v22, %v291_v47 }
 0x257   :  { %365 = vrot.lane.b32.xlu1 %v293_v48, %s3214_s0 }
 0x2c9   :  { %v366_v57 = vpop.permute.xlu1 %365 }
 0x2ca   :  { %2682 = vmatmul.mubr.msk.f32.vlgmr.msra.gmra.mrb[8].mxu0 %vm195_vm3, %v366_v57  ;;  %2693 = vmatmul.mubr.msk.f32.vlgmr.msra.gmra.mrb[4].mxu1 %vm195_vm3, %v366_v57 }
 0x2cb   :  { %2958 = vmatpush3.bf16.msra.mxu1 %v3337_v34  ;;  %2952 = vmatpush3.bf16.msra.mxu0 %v3349_v38 }
 0x2cc   :  { %2959 = vmatprep.subr.bf16.mxu1 %v3210_v0  ;;  %2953 = vmatprep.subr.bf16.mxu0 %v3210_v0 }
 0x2cd   :  { %2714 = vmatprep.mubr.msk.f32.mxu1 %vm3211_vm2, %v3212_v8  ;;  %2703 = vmatprep.mubr.msk.f32.mxu0 %vm3211_vm2, %v3212_v8 }
 0x2cf   :  { %2961 = vmatpush3.bf16.msra.mxu1 %v3362_v42  ;;  %2955 = vmatpush3.bf16.msra.mxu0 %v3368_v44 }
 0x2d0   :  { %2962 = vmatprep.subr.bf16.mxu0 %v3210_v0  ;;  %2968 = vmatprep.subr.bf16.mxu1 %v3210_v0 }
 0x39d   :  { %v435_v60 = vpop.f32.mrb[8].mxu0  ;;  %v536_v61 = vpop.f32.mrb[4].mxu1 }
 0x39e   :  { %v436_v62 = vadd.f32 %v435_v60, %v360_v55  ;;  %v540_v63 = vadd.f32 %v536_v61, %v149_v58  ;;  %v2683_v1 = vpop.f32.mrb[9].mxu0  ;;  %v2694_v2 = vpop.f32.mrb[5].mxu1 }
 0x3a0   :  { %v445_v3 = vadd.f32 %v3424_v59, %v436_v62  ;;  %3089 = vtanh.f32 %v540_v63  ;;  %v2467_v7 = vmul.f32 -1.442695, %v540_v63 }
 0x3a2   :  { %3091 = vtanh.f32 %v445_v3  ;;  %v2465_v9 = vmul.f32 -1.442695, %v445_v3 }
 0x3a3   :  { %3093 = vpow2.f32 %v2467_v7 }
 0x3a4   :  { %3095 = vpow2.f32 %v2465_v9 }
 0x3aa   :  { %v3090_v5 = vpop.eup %3089 }
 0x3ab   :  { %550 = vrot.lane.b32.xlu1 %v3090_v5, %s3213_s23 }
 0x3ac   :  { %v3092_v6 = vpop.eup %3091 }
 0x3ad   :  { %455 = vrot.lane.b32.xlu0 %v3092_v6, %s3213_s23  ;;  %v3094_v11 = vpop.eup %3093 }
 0x3ae   :  { %v3096_v13 = vpop.eup %3095  ;;  %v544_v14 = vadd.f32 1.0, %v3094_v11 }
 0x3af   :  { %v449_v15 = vadd.f32 1.0, %v3096_v13 }
 0x3b0   :  { %3097 = vrcp.f32 %v544_v14 }
 0x3b1   :  { %3099 = vrcp.f32 %v449_v15 }
 0x3ba   :  { %v3098_v16 = vpop.eup %3097 }
 0x3bb   :  { %v3100_v19 = vpop.eup %3099  ;;  %v548_v22 = vmul.f32 %v3098_v16, %v3315_v27 }
 0x3bc   :  { %v453_v25 = vmul.f32 0.0, %v3100_v19 }
 0x41d   :  { %v551_v17 = vpop.permute.xlu1 %550 }
 0x41e   :  { %v553_v18 = vmul.f32 %v3098_v16, %v551_v17 }
 0x41f   :  { %v456_v20 = vpop.permute.xlu0 %455 }
 0x420   :  { %v458_v21 = vmul.f32 %v3100_v19, %v456_v20  ;;  %555 = vrot.lane.b32.xlu1 %v553_v18, %s3213_s23 }
 0x422   :  { %460 = vrot.lane.b32.xlu0 %v458_v21, %s3213_s23 }
 0x492   :  { %v556_v23 = vpop.permute.xlu1 %555 }
 0x493   :  { %v3432_v24 = vadd.f32 %v556_v23, %v548_v22 }
 0x494   :  { %v461_v26 = vpop.permute.xlu0 %460 }
 0x495   :  { %3101 = vtanh.f32 %v3432_v24  ;;  %v3435_v28 = vadd.f32 %v461_v26, %v453_v25 }
 0x497   :  { %3103 = vtanh.f32 %v3435_v28 }
 0x49f   :  { %v3102_v29 = vpop.eup %3101 }
 0x4a0   :  { %561 = vrot.lane.b32.xlu1 %v3102_v29, %s3213_s23  ;;  %v159_v29 = vadd.f32 %v3393_v49, %v3310_v12 }
 0x4a1   :  { %v3104_v30 = vpop.eup %3103 }
 0x4a2   :  { %466 = vrot.lane.b32.xlu0 %v3104_v30, %s3213_s23 }
 0x512   :  { %v562_v31 = vpop.permute.xlu1 %561 }
 0x513   :  { %v564_v32 = vmul.f32 %v3098_v16, %v562_v31 }
 0x514   :  { %v467_v27 = vpop.permute.xlu0 %466 }
 0x515   :  { %v469_v33 = vmul.f32 %v3100_v19, %v467_v27  ;;  %641 = vrot.lane.b32.xlu1 %v564_v32, %s3214_s0 }
 0x517   :  { %566 = vrot.lane.b32.xlu0 %v469_v33, %s3214_s0 }
 0x587   :  { %v642_v35 = vpop.permute.xlu1 %641 }
 0x588   :  { %2715 = vmatmul.mubr.msk.f32.vlgmr.msra.gmra.mrb[6].mxu1 %vm195_vm3, %v642_v35 }
 0x589   :  { %v567_v36 = vpop.permute.xlu0 %566  ;;  %2970 = vmatpush3.bf16.msra.mxu1 %v3349_v38  ;;  %2736 = vmatprep.mubr.msk.f32.mxu1 %vm3211_vm2, %v3212_v8 }
 0x58a   :  { %2704 = vmatmul.mubr.msk.f32.vlgmr.msra.gmra.mrb[10].mxu0 %vm195_vm3, %v567_v36  ;;  %2971 = vmatprep.subr.bf16.mxu1 %v3210_v0 }
 0x58b   :  { %2964 = vmatpush3.bf16.msra.mxu0 %v3275_v4  ;;  %2725 = vmatprep.mubr.msk.f32.mxu0 %vm3211_vm2, %v3212_v8 }
 0x58c   :  { %2965 = vmatprep.subr.bf16.mxu0 %v3210_v0 }
 0x58d   :  { %2973 = vmatpush3.bf16.msra.mxu1 %v3368_v44 }
 0x58e   :  { %2980 = vmatprep.subr.bf16.mxu1 %v3210_v0 }
 0x58f   :  { %2967 = vmatpush3.bf16.msra.mxu0 %v3296_v10 }
 0x590   :  { %2974 = vmatprep.subr.bf16.mxu0 %v3210_v0 }
 0x592   :  { %2726 = vmatmul.mubr.msk.f32.vlgmr.msra.gmra.mrb[12].mxu0 %vm195_vm3, %v642_v35 }
 0x593   :  { %2976 = vmatpush3.bf16.msra.mxu0 %v3337_v34  ;;  %2747 = vmatprep.mubr.msk.f32.mxu0 %vm3211_vm2, %v3212_v8 }
 0x594   :  { %2977 = vmatprep.subr.bf16.mxu0 %v3210_v0 }
 0x597   :  { %2979 = vmatpush3.bf16.msra.mxu0 %v3362_v42 }
 0x598   :  { %2986 = vmatprep.subr.bf16.mxu0 %v3210_v0 }
 0x65b   :  { %v711_v37 = vpop.f32.mrb[6].mxu1 }
 0x65c   :  { %v2716_v39 = vpop.f32.mrb[7].mxu1 }
 0x65d   :  { %v636_v40 = vpop.f32.mrb[10].mxu0 }
 0x65e   :  { %v712_v41 = vadd.f32 %v711_v37, %v636_v40  ;;  %v2705_v43 = vpop.f32.mrb[11].mxu0 }
 0x660   :  { %v715_v45 = vadd.f32 %v3424_v59, %v712_v41 }
 0x662   :  { %3105 = vtanh.f32 %v715_v45  ;;  %v2470_v58 = vmul.f32 -1.442695, %v715_v45 }
 0x665   :  { %v806_v47 = vpop.f32.mrb[12].mxu0 }
 0x666   :  { %v810_v48 = vadd.f32 %v806_v47, %v154_v46  ;;  %v2727_v55 = vpop.f32.mrb[13].mxu0 }
 0x668   :  { %3107 = vtanh.f32 %v810_v48  ;;  %v2472_v60 = vmul.f32 -1.442695, %v810_v48 }
 0x669   :  { %3109 = vpow2.f32 %v2470_v58 }
 0x66a   :  { %3111 = vpow2.f32 %v2472_v60 }
 0x66c   :  { %v3106_v56 = vpop.eup %3105 }
 0x66d   :  { %725 = vrot.lane.b32.xlu0 %v3106_v56, %s3213_s23 }
 0x672   :  { %v3108_v57 = vpop.eup %3107 }
 0x673   :  { %820 = vrot.lane.b32.xlu1 %v3108_v57, %s3213_s23  ;;  %v3110_v61 = vpop.eup %3109 }
 0x674   :  { %v719_v62 = vadd.f32 1.0, %v3110_v61  ;;  %v3112_v63 = vpop.eup %3111 }
 0x675   :  { %v814_v1 = vadd.f32 1.0, %v3112_v63 }
 0x676   :  { %3113 = vrcp.f32 %v719_v62 }
 0x677   :  { %3115 = vrcp.f32 %v814_v1 }
 0x680   :  { %v3114_v50 = vpop.eup %3113 }
 0x681   :  { %v3116_v5 = vpop.eup %3115  ;;  %v723_v9 = vmul.f32 %v3114_v50, %v3435_v28 }
 0x682   :  { %v818_v14 = vmul.f32 %v3116_v5, %v3432_v24 }
 0x6df   :  { %v726_v2 = vpop.permute.xlu0 %725 }
 0x6e0   :  { %v728_v3 = vmul.f32 %v3114_v50, %v726_v2 }
 0x6e2   :  { %730 = vrot.lane.b32.xlu0 %v728_v3, %s3213_s23 }
 0x6e5   :  { %v821_v6 = vpop.permute.xlu1 %820 }
 0x6e6   :  { %v823_v7 = vmul.f32 %v3116_v5, %v821_v6 }
 0x6e8   :  { %825 = vrot.lane.b32.xlu1 %v823_v7, %s3213_s23 }
 0x754   :  { %v731_v11 = vpop.permute.xlu0 %730 }
 0x755   :  { %v3471_v13 = vadd.f32 %v731_v11, %v723_v9 }
 0x757   :  { %3117 = vtanh.f32 %v3471_v13 }
 0x75a   :  { %v826_v15 = vpop.permute.xlu1 %825 }
 0x75b   :  { %v3475_v16 = vadd.f32 %v826_v15, %v818_v14 }
 0x75d   :  { %3119 = vtanh.f32 %v3475_v16 }
 0x761   :  { %v3118_v17 = vpop.eup %3117 }
 0x762   :  { %736 = vrot.lane.b32.xlu0 %v3118_v17, %s3213_s23 }
 0x767   :  { %v3120_v18 = vpop.eup %3119 }
 0x768   :  { %831 = vrot.lane.b32.xlu1 %v3120_v18, %s3213_s23 }
 0x7d4   :  { %v737_v19 = vpop.permute.xlu0 %736 }
 0x7d5   :  { %v739_v20 = vmul.f32 %v3114_v50, %v737_v19  ;;  %v164_v19 = vadd.f32 %v3310_v12, %v3399_v52 }
 0x7d7   :  { %836 = vrot.lane.b32.xlu0 %v739_v20, %s3214_s0 }
 0x7da   :  { %v832_v21 = vpop.permute.xlu1 %831 }
 0x7db   :  { %v834_v22 = vmul.f32 %v3116_v5, %v832_v21 }
 0x7dd   :  { %911 = vrot.lane.b32.xlu1 %v834_v22, %s3214_s0 }
 0x849   :  { %v837_v23 = vpop.permute.xlu0 %836 }
 0x84a   :  { %2737 = vmatmul.mubr.msk.f32.vlgmr.msra.gmra.mrb[8].mxu1 %vm195_vm3, %v837_v23 }
 0x84b   :  { %2982 = vmatpush3.bf16.msra.mxu1 %v3275_v4  ;;  %2758 = vmatprep.mubr.msk.f32.mxu1 %vm3211_vm2, %v3212_v8 }
 0x84c   :  { %2983 = vmatprep.subr.bf16.mxu1 %v3210_v0 }
 0x84f   :  { %2985 = vmatpush3.bf16.msra.mxu1 %v3296_v10  ;;  %v912_v24 = vpop.permute.xlu1 %911 }
 0x850   :  { %2748 = vmatmul.mubr.msk.f32.vlgmr.msra.gmra.mrb[14].mxu0 %vm195_vm3, %v912_v24  ;;  %2992 = vmatprep.subr.bf16.mxu1 %v3210_v0 }
 0x851   :  { %2988 = vmatpush3.bf16.msra.mxu0 %v3349_v38  ;;  %2769 = vmatprep.mubr.msk.f32.mxu0 %vm3211_vm2, %v3212_v8 }
 0x852   :  { %2759 = vmatmul.mubr.msk.f32.vlgmr.msra.gmra.mrb[10].mxu1 %vm195_vm3, %v912_v24  ;;  %2989 = vmatprep.subr.bf16.mxu0 %v3210_v0 }
 0x853   :  { %2994 = vmatpush3.bf16.msra.mxu1 %v3337_v34  ;;  %2780 = vmatprep.mubr.msk.f32.mxu1 %vm3211_vm2, %v3212_v8 }
 0x854   :  { %2995 = vmatprep.subr.bf16.mxu1 %v3210_v0 }
 0x855   :  { %2991 = vmatpush3.bf16.msra.mxu0 %v3368_v44 }
 0x856   :  { %2998 = vmatprep.subr.bf16.mxu0 %v3210_v0 }
 0x857   :  { %2997 = vmatpush3.bf16.msra.mxu1 %v3362_v42 }
 0x858   :  { %3004 = vmatprep.subr.bf16.mxu1 %v3210_v0 }
 0x91d   :  { %v906_v25 = vpop.f32.mrb[8].mxu1 }
 0x91e   :  { %v2738_v26 = vpop.f32.mrb[9].mxu1 }
 0x923   :  { %v981_v28 = vpop.f32.mrb[14].mxu0 }
 0x924   :  { %v982_v30 = vadd.f32 %v981_v28, %v906_v25  ;;  %v2749_v31 = vpop.f32.mrb[15].mxu0 }
 0x925   :  { %v1076_v32 = vpop.f32.mrb[10].mxu1 }
 0x926   :  { %v985_v27 = vadd.f32 %v3424_v59, %v982_v30  ;;  %v1080_v33 = vadd.f32 %v1076_v32, %v159_v29  ;;  %v2760_v35 = vpop.f32.mrb[11].mxu1 }
 0x928   :  { %3121 = vtanh.f32 %v985_v27  ;;  %v2475_v39 = vmul.f32 -1.442695, %v985_v27  ;;  %v2477_v40 = vmul.f32 -1.442695, %v1080_v33 }
 0x929   :  { %3123 = vtanh.f32 %v1080_v33 }
 0x92a   :  { %3125 = vpow2.f32 %v2475_v39 }
 0x92b   :  { %3127 = vpow2.f32 %v2477_v40 }
 0x932   :  { %v3122_v36 = vpop.eup %3121 }
 0x933   :  { %v3124_v37 = vpop.eup %3123  ;;  %995 = vrot.lane.b32.xlu0 %v3122_v36, %s3213_s23 }
 0x934   :  { %1090 = vrot.lane.b32.xlu1 %v3124_v37, %s3213_s23  ;;  %v3126_v49 = vpop.eup %3125 }
 0x935   :  { %v3128_v41 = vpop.eup %3127  ;;  %v989_v43 = vadd.f32 1.0, %v3126_v49 }
 0x936   :  { %v1084_v45 = vadd.f32 1.0, %v3128_v41 }
 0x937   :  { %3129 = vrcp.f32 %v989_v43 }
 0x938   :  { %3131 = vrcp.f32 %v1084_v45 }
 0x941   :  { %v3130_v46 = vpop.eup %3129 }
 0x942   :  { %v3132_v48 = vpop.eup %3131  ;;  %v993_v58 = vmul.f32 %v3130_v46, %v3471_v13 }
 0x943   :  { %v1088_v60 = vmul.f32 %v3132_v48, %v3475_v16 }
 0x9a5   :  { %v996_v47 = vpop.permute.xlu0 %995 }
 0x9a6   :  { %v1091_v55 = vpop.permute.xlu1 %1090  ;;  %v998_v56 = vmul.f32 %v3130_v46, %v996_v47 }
 0x9a7   :  { %v1093_v57 = vmul.f32 %v3132_v48, %v1091_v55 }
 0x9a8   :  { %1000 = vrot.lane.b32.xlu0 %v998_v56, %s3213_s23 }
 0x9a9   :  { %1095 = vrot.lane.b32.xlu1 %v1093_v57, %s3213_s23 }
 0xa1a   :  { %v1001_v61 = vpop.permute.xlu0 %1000 }
 0xa1b   :  { %v1096_v62 = vpop.permute.xlu1 %1095  ;;  %v3512_v63 = vadd.f32 %v1001_v61, %v993_v58 }
 0xa1c   :  { %v3514_v1 = vadd.f32 %v1096_v62, %v1088_v60 }
 0xa1d   :  { %3133 = vtanh.f32 %v3512_v63 }
 0xa1e   :  { %3135 = vtanh.f32 %v3514_v1 }
 0xa27   :  { %v3134_v50 = vpop.eup %3133 }
 0xa28   :  { %v3136_v2 = vpop.eup %3135  ;;  %1006 = vrot.lane.b32.xlu0 %v3134_v50, %s3213_s23  ;;  %v169_v50 = vadd.f32 %v3397_v51, %v3310_v12 }
 0xa29   :  { %1101 = vrot.lane.b32.xlu1 %v3136_v2, %s3213_s23 }
 0xa9a   :  { %v1007_v3 = vpop.permute.xlu0 %1006 }
 0xa9b   :  { %v1102_v5 = vpop.permute.xlu1 %1101  ;;  %v1009_v6 = vmul.f32 %v3130_v46, %v1007_v3 }
 0xa9c   :  { %v1104_v7 = vmul.f32 %v3132_v48, %v1102_v5 }
 0xa9d   :  { %1106 = vrot.lane.b32.xlu0 %v1009_v6, %s3214_s0 }
 0xa9e   :  { %1181 = vrot.lane.b32.xlu1 %v1104_v7, %s3214_s0 }
 0xb0f   :  { %v1107_v9 = vpop.permute.xlu0 %1106 }
 0xb10   :  { %v1182_v11 = vpop.permute.xlu1 %1181  ;;  %2770 = vmatmul.mubr.msk.f32.vlgmr.msra.gmra.mrb[16].mxu0 %vm195_vm3, %v1107_v9 }
 0xb11   :  { %2781 = vmatmul.mubr.msk.f32.vlgmr.msra.gmra.mrb[12].mxu1 %vm195_vm3, %v1182_v11  ;;  %3000 = vmatpush3.bf16.msra.mxu0 %v3275_v4 }
 0xb12   :  { %3001 = vmatprep.subr.bf16.mxu0 %v3210_v0  ;;  %2791 = vmatprep.mubr.msk.f32.mxu0 %vm3211_vm2, %v3212_v8 }
 0xb13   :  { %3006 = vmatpush3.bf16.msra.mxu1 %v3349_v38  ;;  %2802 = vmatprep.mubr.msk.f32.mxu1 %vm3211_vm2, %v3212_v8 }
 0xb14   :  { %3007 = vmatprep.subr.bf16.mxu1 %v3210_v0 }
 0xb15   :  { %3003 = vmatpush3.bf16.msra.mxu0 %v3296_v10 }
 0xb16   :  { %3010 = vmatprep.subr.bf16.mxu0 %v3210_v0 }
 0xb17   :  { %3009 = vmatpush3.bf16.msra.mxu1 %v3368_v44 }
 0xb18   :  { %2792 = vmatmul.mubr.msk.f32.vlgmr.msra.gmra.mrb[18].mxu0 %vm195_vm3, %v1182_v11  ;;  %3016 = vmatprep.subr.bf16.mxu1 %v3210_v0 }
 0xb19   :  { %3012 = vmatpush3.bf16.msra.mxu0 %v3337_v34  ;;  %2813 = vmatprep.mubr.msk.f32.mxu0 %vm3211_vm2, %v3212_v8 }
 0xb1a   :  { %3013 = vmatprep.subr.bf16.mxu0 %v3210_v0 }
 0xb1d   :  { %3015 = vmatpush3.bf16.msra.mxu0 %v3362_v42 }
 0xb1e   :  { %3022 = vmatprep.subr.bf16.mxu0 %v3210_v0 }
 0xbe3   :  { %v1176_v13 = vpop.f32.mrb[16].mxu0 }
 0xbe4   :  { %v1251_v14 = vpop.f32.mrb[12].mxu1  ;;  %v2771_v15 = vpop.f32.mrb[17].mxu0 }
 0xbe5   :  { %v1252_v16 = vadd.f32 %v1251_v14, %v1176_v13  ;;  %v2782_v17 = vpop.f32.mrb[13].mxu1 }
 0xbe7   :  { %v1255_v18 = vadd.f32 %v3424_v59, %v1252_v16 }
 0xbe9   :  { %3137 = vtanh.f32 %v1255_v18  ;;  %v2480_v25 = vmul.f32 -1.442695, %v1255_v18 }
 0xbeb   :  { %v1346_v20 = vpop.f32.mrb[18].mxu0 }
 0xbec   :  { %v1350_v21 = vadd.f32 %v1346_v20, %v164_v19  ;;  %v2793_v22 = vpop.f32.mrb[19].mxu0 }
 0xbee   :  { %3139 = vtanh.f32 %v1350_v21  ;;  %v2482_v26 = vmul.f32 -1.442695, %v1350_v21 }
 0xbef   :  { %3141 = vpow2.f32 %v2480_v25 }
 0xbf0   :  { %3143 = vpow2.f32 %v2482_v26 }
 0xbf3   :  { %v3138_v23 = vpop.eup %3137 }
 0xbf4   :  { %1265 = vrot.lane.b32.xlu0 %v3138_v23, %s3213_s23 }
 0xbf8   :  { %v3140_v24 = vpop.eup %3139 }
 0xbf9   :  { %1360 = vrot.lane.b32.xlu1 %v3140_v24, %s3213_s23  ;;  %v3142_v28 = vpop.eup %3141 }
 0xbfa   :  { %v1259_v29 = vadd.f32 1.0, %v3142_v28  ;;  %v3144_v30 = vpop.eup %3143 }
 0xbfb   :  { %v1354_v31 = vadd.f32 1.0, %v3144_v30 }
 0xbfc   :  { %3145 = vrcp.f32 %v1259_v29 }
 0xbfd   :  { %3147 = vrcp.f32 %v1354_v31 }
 0xc06   :  { %v3146_v52 = vpop.eup %3145 }
 0xc07   :  { %v3148_v33 = vpop.eup %3147  ;;  %v1263_v37 = vmul.f32 %v3146_v52, %v3512_v63 }
 0xc08   :  { %v1358_v49 = vmul.f32 %v3148_v33, %v3514_v1 }
 0xc66   :  { %v1266_v32 = vpop.permute.xlu0 %1265 }
 0xc67   :  { %v1268_v27 = vmul.f32 %v3146_v52, %v1266_v32 }
 0xc69   :  { %1270 = vrot.lane.b32.xlu0 %v1268_v27, %s3213_s23 }
 0xc6b   :  { %v1361_v35 = vpop.permute.xlu1 %1360 }
 0xc6c   :  { %v1363_v36 = vmul.f32 %v3148_v33, %v1361_v35 }
 0xc6e   :  { %1365 = vrot.lane.b32.xlu1 %v1363_v36, %s3213_s23 }
 0xcdb   :  { %v1271_v39 = vpop.permute.xlu0 %1270 }
 0xcdc   :  { %v3551_v40 = vadd.f32 %v1271_v39, %v1263_v37 }
 0xcde   :  { %3149 = vtanh.f32 %v3551_v40 }
 0xce0   :  { %v1366_v41 = vpop.permute.xlu1 %1365 }
 0xce1   :  { %v3555_v43 = vadd.f32 %v1366_v41, %v1358_v49 }
 0xce3   :  { %3151 = vtanh.f32 %v3555_v43 }
 0xce8   :  { %v3150_v45 = vpop.eup %3149 }
 0xce9   :  { %1276 = vrot.lane.b32.xlu0 %v3150_v45, %s3213_s23  ;;  %v174_v45 = vadd.f32 %v3310_v12, %v3403_v54 }
 0xced   :  { %v3152_v46 = vpop.eup %3151 }
 0xcee   :  { %1371 = vrot.lane.b32.xlu1 %v3152_v46, %s3213_s23 }
 0xd5b   :  { %v1277_v47 = vpop.permute.xlu0 %1276 }
 0xd5c   :  { %v1279_v48 = vmul.f32 %v3146_v52, %v1277_v47 }
 0xd5e   :  { %1376 = vrot.lane.b32.xlu0 %v1279_v48, %s3214_s0 }
 0xd60   :  { %v1372_v55 = vpop.permute.xlu1 %1371 }
 0xd61   :  { %v1374_v56 = vmul.f32 %v3148_v33, %v1372_v55 }
 0xd63   :  { %1451 = vrot.lane.b32.xlu1 %v1374_v56, %s3214_s0 }
 0xdd0   :  { %v1377_v57 = vpop.permute.xlu0 %1376 }
 0xdd1   :  { %2803 = vmatmul.mubr.msk.f32.vlgmr.msra.gmra.mrb[14].mxu1 %vm195_vm3, %v1377_v57 }
 0xdd2   :  { %3018 = vmatpush3.bf16.msra.mxu1 %v3275_v4  ;;  %2824 = vmatprep.mubr.msk.f32.mxu1 %vm3211_vm2, %v3212_v8 }
 0xdd3   :  { %3019 = vmatprep.subr.bf16.mxu1 %v3210_v0 }
 0xdd5   :  { %v1452_v58 = vpop.permute.xlu1 %1451 }
 0xdd6   :  { %3021 = vmatpush3.bf16.msra.mxu1 %v3296_v10  ;;  %2814 = vmatmul.mubr.msk.f32.vlgmr.msra.gmra.mrb[20].mxu0 %vm195_vm3, %v1452_v58 }
 0xdd7   :  { %3024 = vmatpush3.bf16.msra.mxu0 %v3349_v38  ;;  %3028 = vmatprep.subr.bf16.mxu1 %v3210_v0 }
 0xdd8   :  { %3025 = vmatprep.subr.bf16.mxu0 %v3210_v0  ;;  %2835 = vmatprep.mubr.msk.f32.mxu0 %vm3211_vm2, %v3212_v8 }
 0xdd9   :  { %2825 = vmatmul.mubr.msk.f32.vlgmr.msra.gmra.mrb[16].mxu1 %vm195_vm3, %v1452_v58 }
 0xdda   :  { %3030 = vmatpush3.bf16.msra.mxu1 %v3337_v34  ;;  %2846 = vmatprep.mubr.msk.f32.mxu1 %vm3211_vm2, %v3212_v8 }
 0xddb   :  { %3027 = vmatpush3.bf16.msra.mxu0 %v3368_v44  ;;  %3031 = vmatprep.subr.bf16.mxu1 %v3210_v0 }
 0xddc   :  { %3034 = vmatprep.subr.bf16.mxu0 %v3210_v0 }
 0xdde   :  { %3033 = vmatpush3.bf16.msra.mxu1 %v3362_v42 }
 0xddf   :  { %3040 = vmatprep.subr.bf16.mxu1 %v3210_v0 }
 0xea4   :  { %v1446_v60 = vpop.f32.mrb[14].mxu1 }
 0xea5   :  { %v2804_v61 = vpop.f32.mrb[15].mxu1 }
 0xea9   :  { %v1521_v62 = vpop.f32.mrb[20].mxu0 }
 0xeaa   :  { %v1522_v63 = vadd.f32 %v1521_v62, %v1446_v60  ;;  %v2815_v1 = vpop.f32.mrb[21].mxu0 }
 0xeac   :  { %v1525_v2 = vadd.f32 %v3424_v59, %v1522_v63  ;;  %v1616_v3 = vpop.f32.mrb[16].mxu1 }
 0xead   :  { %v1620_v5 = vadd.f32 %v1616_v3, %v169_v50  ;;  %v2826_v6 = vpop.f32.mrb[17].mxu1 }
 0xeae   :  { %3153 = vtanh.f32 %v1525_v2  ;;  %v2485_v11 = vmul.f32 -1.442695, %v1525_v2 }
 0xeaf   :  { %3155 = vtanh.f32 %v1620_v5  ;;  %v2487_v13 = vmul.f32 -1.442695, %v1620_v5 }
 0xeb0   :  { %3157 = vpow2.f32 %v2485_v11 }
 0xeb1   :  { %3159 = vpow2.f32 %v2487_v13 }
 0xeb8   :  { %v3154_v7 = vpop.eup %3153 }
 0xeb9   :  { %v3156_v9 = vpop.eup %3155  ;;  %1535 = vrot.lane.b32.xlu0 %v3154_v7, %s3213_s23 }
 0xeba   :  { %1630 = vrot.lane.b32.xlu1 %v3156_v9, %s3213_s23  ;;  %v3158_v14 = vpop.eup %3157 }
 0xebb   :  { %v3160_v15 = vpop.eup %3159  ;;  %v1529_v51 = vadd.f32 1.0, %v3158_v14 }
 0xebc   :  { %v1624_v16 = vadd.f32 1.0, %v3160_v15 }
 0xebd   :  { %3161 = vrcp.f32 %v1529_v51 }
 0xebe   :  { %3163 = vrcp.f32 %v1624_v16 }
 0xec7   :  { %v3162_v17 = vpop.eup %3161 }
 0xec8   :  { %v3164_v19 = vpop.eup %3163  ;;  %v1533_v23 = vmul.f32 %v3162_v17, %v3551_v40 }
 0xec9   :  { %v1628_v24 = vmul.f32 %v3164_v19, %v3555_v43 }
 0xf2b   :  { %v1536_v18 = vpop.permute.xlu0 %1535 }
 0xf2c   :  { %v1631_v20 = vpop.permute.xlu1 %1630  ;;  %v1538_v21 = vmul.f32 %v3162_v17, %v1536_v18 }
 0xf2d   :  { %v1633_v22 = vmul.f32 %v3164_v19, %v1631_v20 }
 0xf2e   :  { %1540 = vrot.lane.b32.xlu0 %v1538_v21, %s3213_s23 }
 0xf2f   :  { %1635 = vrot.lane.b32.xlu1 %v1633_v22, %s3213_s23 }
 0xfa0   :  { %v1541_v25 = vpop.permute.xlu0 %1540 }
 0xfa1   :  { %v1636_v26 = vpop.permute.xlu1 %1635  ;;  %v3592_v28 = vadd.f32 %v1541_v25, %v1533_v23 }
 0xfa2   :  { %v3594_v29 = vadd.f32 %v1636_v26, %v1628_v24 }
 0xfa3   :  { %3165 = vtanh.f32 %v3592_v28 }
 0xfa4   :  { %3167 = vtanh.f32 %v3594_v29 }
 0xfad   :  { %v3166_v30 = vpop.eup %3165 }
 0xfae   :  { %v3168_v31 = vpop.eup %3167  ;;  %1546 = vrot.lane.b32.xlu0 %v3166_v30, %s3213_s23 }
 0xfaf   :  { %1641 = vrot.lane.b32.xlu1 %v3168_v31, %s3213_s23 }
0x1020   :  { %v1547_v52 = vpop.permute.xlu0 %1546 }
0x1021   :  { %v1642_v32 = vpop.permute.xlu1 %1641  ;;  %v1549_v27 = vmul.f32 %v3162_v17, %v1547_v52 }
0x1022   :  { %v1644_v33 = vmul.f32 %v3164_v19, %v1642_v32 }
0x1023   :  { %1646 = vrot.lane.b32.xlu0 %v1549_v27, %s3214_s0 }
0x1024   :  { %1721 = vrot.lane.b32.xlu1 %v1644_v33, %s3214_s0 }
0x1095   :  { %v1647_v35 = vpop.permute.xlu0 %1646 }
0x1096   :  { %v1722_v36 = vpop.permute.xlu1 %1721  ;;  %2836 = vmatmul.mubr.msk.f32.vlgmr.msra.gmra.mrb[22].mxu0 %vm195_vm3, %v1647_v35 }
0x1097   :  { %2847 = vmatmul.mubr.msk.f32.vlgmr.msra.gmra.mrb[18].mxu1 %vm195_vm3, %v1722_v36  ;;  %3036 = vmatpush3.bf16.msra.mxu0 %v3275_v4 }
0x1098   :  { %3037 = vmatprep.subr.bf16.mxu0 %v3210_v0  ;;  %2857 = vmatprep.mubr.msk.f32.mxu0 %vm3211_vm2, %v3212_v8 }
0x1099   :  { %3042 = vmatpush3.bf16.msra.mxu1 %v3349_v38  ;;  %2868 = vmatprep.mubr.msk.f32.mxu1 %vm3211_vm2, %v3212_v8 }
0x109a   :  { %3043 = vmatprep.subr.bf16.mxu1 %v3210_v0 }
0x109b   :  { %3039 = vmatpush3.bf16.msra.mxu0 %v3296_v10 }
0x109c   :  { %3046 = vmatprep.subr.bf16.mxu0 %v3210_v0 }
0x109d   :  { %3045 = vmatpush3.bf16.msra.mxu1 %v3368_v44 }
0x109e   :  { %2858 = vmatmul.mubr.msk.f32.vlgmr.msra.gmra.mrb[24].mxu0 %vm195_vm3, %v1722_v36  ;;  %3052 = vmatprep.subr.bf16.mxu1 %v3210_v0 }
0x109f   :  { %3048 = vmatpush3.bf16.msra.mxu0 %v3337_v34  ;;  %2879 = vmatprep.mubr.msk.f32.mxu0 %vm3211_vm2, %v3212_v8 }
0x10a0   :  { %3049 = vmatprep.subr.bf16.mxu0 %v3210_v0 }
0x10a3   :  { %3051 = vmatpush3.bf16.msra.mxu0 %v3362_v42 }
0x10a4   :  { %3058 = vmatprep.subr.bf16.mxu0 %v3210_v0 }
0x1169   :  { %v1716_v37 = vpop.f32.mrb[22].mxu0 }
0x116a   :  { %v1791_v39 = vpop.f32.mrb[18].mxu1  ;;  %v2837_v40 = vpop.f32.mrb[23].mxu0 }
0x116b   :  { %v1792_v49 = vadd.f32 %v1791_v39, %v1716_v37  ;;  %v2848_v41 = vpop.f32.mrb[19].mxu1 }
0x116d   :  { %v1795_v43 = vadd.f32 %v3424_v59, %v1792_v49 }
0x116f   :  { %3169 = vtanh.f32 %v1795_v43  ;;  %v2490_v57 = vmul.f32 -1.442695, %v1795_v43 }
0x1171   :  { %v1886_v46 = vpop.f32.mrb[24].mxu0 }
0x1172   :  { %v1890_v47 = vadd.f32 %v1886_v46, %v174_v45  ;;  %v2859_v48 = vpop.f32.mrb[25].mxu0 }
0x1174   :  { %3171 = vtanh.f32 %v1890_v47  ;;  %v2492_v58 = vmul.f32 -1.442695, %v1890_v47 }
0x1175   :  { %3173 = vpow2.f32 %v2490_v57 }
0x1176   :  { %3175 = vpow2.f32 %v2492_v58 }
0x1179   :  { %v3170_v55 = vpop.eup %3169 }
0x117a   :  { %1805 = vrot.lane.b32.xlu0 %v3170_v55, %s3213_s23 }
0x117e   :  { %v3172_v56 = vpop.eup %3171 }
0x117f   :  { %1900 = vrot.lane.b32.xlu1 %v3172_v56, %s3213_s23  ;;  %v3174_v60 = vpop.eup %3173 }
0x1180   :  { %v1799_v61 = vadd.f32 1.0, %v3174_v60  ;;  %v3176_v62 = vpop.eup %3175 }
0x1181   :  { %v1894_v63 = vadd.f32 1.0, %v3176_v62 }
0x1182   :  { %3177 = vrcp.f32 %v1799_v61 }
0x1183   :  { %3179 = vrcp.f32 %v1894_v63 }
0x118c   :  { %v3178_v12 = vpop.eup %3177 }
0x118d   :  { %v3180_v50 = vpop.eup %3179  ;;  %v1803_v5 = vmul.f32 %v3178_v12, %v3592_v28 }
0x118e   :  { %v1898_v9 = vmul.f32 %v3180_v50, %v3594_v29 }
0x11ec   :  { %v1806_v54 = vpop.permute.xlu0 %1805 }
0x11ed   :  { %v1808_v1 = vmul.f32 %v3178_v12, %v1806_v54 }
0x11ef   :  { %1810 = vrot.lane.b32.xlu0 %v1808_v1, %s3213_s23 }
0x11f1   :  { %v1901_v2 = vpop.permute.xlu1 %1900 }
0x11f2   :  { %v1903_v3 = vmul.f32 %v3180_v50, %v1901_v2 }
0x11f4   :  { %1905 = vrot.lane.b32.xlu1 %v1903_v3, %s3213_s23 }
0x1261   :  { %v1811_v6 = vpop.permute.xlu0 %1810 }
0x1262   :  { %v3631_v7 = vadd.f32 %v1811_v6, %v1803_v5 }
0x1264   :  { %3181 = vtanh.f32 %v3631_v7 }
0x1266   :  { %v1906_v11 = vpop.permute.xlu1 %1905 }
0x1267   :  { %v3635_v13 = vadd.f32 %v1906_v11, %v1898_v9 }
0x1269   :  { %3183 = vtanh.f32 %v3635_v13 }
0x126e   :  { %v3182_v14 = vpop.eup %3181 }
0x126f   :  { %1816 = vrot.lane.b32.xlu0 %v3182_v14, %s3213_s23 }
0x1273   :  { %v3184_v15 = vpop.eup %3183 }
0x1274   :  { %1911 = vrot.lane.b32.xlu1 %v3184_v15, %s3213_s23  ;;  %v2361_v15 = vld [vmem:[%s3713_s7 + $0x8] sm:$0xff] }
0x12e1   :  { %v1817_v51 = vpop.permute.xlu0 %1816 }
0x12e2   :  { %v1819_v16 = vmul.f32 %v3178_v12, %v1817_v51  ;;  %v2362_v51 = vld [vmem:[%s3713_s7 + $0x10] sm:$0xff] }
0x12e4   :  { %1916 = vrot.lane.b32.xlu0 %v1819_v16, %s3214_s0 }
0x12e6   :  { %v1912_v17 = vpop.permute.xlu1 %1911 }
0x12e7   :  { %v1914_v18 = vmul.f32 %v3180_v50, %v1912_v17  ;;  %v2363_v17 = vld [vmem:[%s3713_s7 + $0x18] sm:$0xff] }
0x12e9   :  { %1991 = vrot.lane.b32.xlu1 %v1914_v18, %s3214_s0  ;;  %v3074_v18 = vpack.c.bf16 %v2363_v17, %v2362_v51 }
0x1356   :  { %v1917_v19 = vpop.permute.xlu0 %1916 }
0x1357   :  { %2869 = vmatmul.mubr.msk.f32.vlgmr.msra.gmra.mrb[20].mxu1 %vm195_vm3, %v1917_v19 }
0x1358   :  { %3054 = vmatpush3.bf16.msra.mxu1 %v3275_v4  ;;  %2890 = vmatprep.mubr.msk.f32.mxu1 %vm3211_vm2, %v3212_v8 }
0x1359   :  { %3055 = vmatprep.subr.bf16.mxu1 %v3210_v0 }
0x135b   :  { %v1992_v20 = vpop.permute.xlu1 %1991 }
0x135c   :  { %3057 = vmatpush3.bf16.msra.mxu1 %v3296_v10  ;;  %2880 = vmatmul.mubr.msk.f32.vlgmr.msra.gmra.mrb[26].mxu0 %vm195_vm3, %v1992_v20 }
0x135d   :  { %3064 = vmatprep.subr.bf16.mxu1 %v3210_v0  ;;  %3060 = vmatpush3.bf16.msra.mxu0 %v3349_v38 }
0x135e   :  { %3061 = vmatprep.subr.bf16.mxu0 %v3210_v0  ;;  %2901 = vmatprep.mubr.msk.f32.mxu0 %vm3211_vm2, %v3212_v8 }
0x135f   :  { %2891 = vmatmul.mubr.msk.f32.vlgmr.msra.gmra.mrb[22].mxu1 %vm195_vm3, %v1992_v20 }
0x1360   :  { %3066 = vmatpush3.bf16.msra.mxu1 %v3337_v34  ;;  %2912 = vmatprep.mubr.msk.f32.mxu1 %vm3211_vm2, %v3212_v8  ;;  %v3209_v34 = vld [vmem:[%s3709_s3] ss:$0 sm:$0xff] }
0x1361   :  { %3067 = vmatprep.subr.bf16.mxu1 %v3210_v0  ;;  %3063 = vmatpush3.bf16.msra.mxu0 %v3368_v44  ;;  %v179_v23 = vadd.f32 %v3209_v34, %v3401_v53 }
0x1362   :  { %3070 = vmatprep.subr.bf16.mxu0 %v3210_v0 }
0x1364   :  { %3069 = vmatpush3.bf16.msra.mxu1 %v3362_v42 }
0x142a   :  { %v1986_v4 = vpop.f32.mrb[20].mxu1 }
0x142b   :  { %v2870_v10 = vpop.f32.mrb[21].mxu1 }
0x142f   :  { %v2061_v38 = vpop.f32.mrb[26].mxu0 }
0x1430   :  { %v2062_v21 = vadd.f32 %v2061_v38, %v1986_v4  ;;  %v2881_v22 = vpop.f32.mrb[27].mxu0  ;;  %v2501_v38 = vld [vmem:[%s3714_s8] ss:$0 sm:$0xff] }
0x1432   :  { %v2065_v24 = vadd.f32 %v3424_v59, %v2062_v21  ;;  %v2156_v25 = vpop.f32.mrb[22].mxu1 }
0x1433   :  { %v2160_v26 = vadd.f32 %v2156_v25, %v179_v23  ;;  %v2892_v44 = vpop.f32.mrb[23].mxu1 }
0x1434   :  { %3185 = vtanh.f32 %v2065_v24  ;;  %v2495_v29 = vmul.f32 -1.442695, %v2065_v24 }
0x1435   :  { %3187 = vtanh.f32 %v2160_v26  ;;  %v2497_v30 = vmul.f32 -1.442695, %v2160_v26 }
0x1436   :  { %3189 = vpow2.f32 %v2495_v29 }
0x1437   :  { %3191 = vpow2.f32 %v2497_v30 }
0x143e   :  { %v3186_v28 = vpop.eup %3185 }
0x143f   :  { %v3188_v42 = vpop.eup %3187  ;;  %2075 = vrot.lane.b32.xlu0 %v3186_v28, %s3213_s23 }
0x1440   :  { %2170 = vrot.lane.b32.xlu1 %v3188_v42, %s3213_s23  ;;  %v3190_v31 = vpop.eup %3189 }
0x1441   :  { %v3192_v52 = vpop.eup %3191  ;;  %v2069_v53 = vadd.f32 1.0, %v3190_v31 }
0x1442   :  { %v2164_v32 = vadd.f32 1.0, %v3192_v52 }
0x1443   :  { %3193 = vrcp.f32 %v2069_v53 }
0x1444   :  { %3195 = vrcp.f32 %v2164_v32 }
0x144d   :  { %v3194_v27 = vpop.eup %3193 }
0x144e   :  { %v3196_v35 = vpop.eup %3195  ;;  %v2073_v40 = vmul.f32 %v3194_v27, %v3631_v7 }
0x144f   :  { %v2168_v49 = vmul.f32 %v3196_v35, %v3635_v13 }
0x14b1   :  { %v2076_v33 = vpop.permute.xlu0 %2075 }
0x14b2   :  { %v2171_v36 = vpop.permute.xlu1 %2170  ;;  %v2078_v37 = vmul.f32 %v3194_v27, %v2076_v33 }
0x14b3   :  { %v2173_v39 = vmul.f32 %v3196_v35, %v2171_v36 }
0x14b4   :  { %2080 = vrot.lane.b32.xlu0 %v2078_v37, %s3213_s23 }
0x14b5   :  { %2175 = vrot.lane.b32.xlu1 %v2173_v39, %s3213_s23 }
0x1526   :  { %v2081_v41 = vpop.permute.xlu0 %2080 }
0x1527   :  { %v2176_v43 = vpop.permute.xlu1 %2175  ;;  %v2083_v45 = vadd.f32 %v2081_v41, %v2073_v40 }
0x1528   :  { %v2178_v46 = vadd.f32 %v2176_v43, %v2168_v49 }
0x1529   :  { %3197 = vtanh.f32 %v2083_v45 }
0x152a   :  { %3199 = vtanh.f32 %v2178_v46 }
0x1533   :  { %v3198_v47 = vpop.eup %3197 }
0x1534   :  { %v3200_v48 = vpop.eup %3199  ;;  %2086 = vrot.lane.b32.xlu0 %v3198_v47, %s3213_s23 }
0x1535   :  { %2181 = vrot.lane.b32.xlu1 %v3200_v48, %s3213_s23 }
0x15a6   :  { %v2087_v55 = vpop.permute.xlu0 %2086 }
0x15a7   :  { %v2182_v56 = vpop.permute.xlu1 %2181  ;;  %v2089_v57 = vmul.f32 %v3194_v27, %v2087_v55 }
0x15a8   :  { %v2184_v58 = vmul.f32 %v3196_v35, %v2182_v56 }
0x15a9   :  { %2186 = vrot.lane.b32.xlu0 %v2089_v57, %s3214_s0 }
0x15aa   :  { %2261 = vrot.lane.b32.xlu1 %v2184_v58, %s3214_s0 }
0x161b   :  { %v2187_v60 = vpop.permute.xlu0 %2186 }
0x161c   :  { %v2262_v61 = vpop.permute.xlu1 %2261  ;;  %2902 = vmatmul.mubr.msk.f32.vlgmr.msra.gmra.mrb[28].mxu0 %vm195_vm3, %v2187_v60 }
0x161d   :  { %2913 = vmatmul.mubr.msk.f32.vlgmr.msra.gmra.mrb[24].mxu1 %vm195_vm3, %v2262_v61  ;;  %2923 = vmatprep.mubr.msk.f32.mxu0 %vm3211_vm2, %v3212_v8 }
0x16ef   :  { %v2256_v62 = vpop.f32.mrb[28].mxu0 }
0x16f0   :  { %v2331_v63 = vpop.f32.mrb[24].mxu1  ;;  %v2903_v12 = vpop.f32.mrb[29].mxu0 }
0x16f1   :  { %v2332_v54 = vadd.f32 %v2331_v63, %v2256_v62  ;;  %v2914_v1 = vpop.f32.mrb[25].mxu1 }
0x16f3   :  { %v2335_v50 = vadd.f32 %v3424_v59, %v2332_v54  ;;  %v2360_v59 = vld [vmem:[%s3713_s7] sm:$0xff] }
0x16f4   :  { %v3071_v16 = vpack.c.bf16 %v2361_v15, %v2360_v59 }
0x16f5   :  { %3201 = vtanh.f32 %v2335_v50  ;;  %v2500_v3 = vmul.f32 -1.442695, %v2335_v50 }
0x16f6   :  { %3072 = vmatpush3.bf16.msra.mxu0 %v3071_v16 }
0x16f7   :  { %3203 = vpow2.f32 %v2500_v3  ;;  %3073 = vmatprep.subr.bf16.mxu0 %v3210_v0 }
0x16fa   :  { %3075 = vmatpush3.bf16.msra.mxu0 %v3074_v18 }
0x16ff   :  { %v3202_v2 = vpop.eup %3201 }
0x1700   :  { %2345 = vrot.lane.b32.xlu0 %v3202_v2, %s3213_s23 }
0x1701   :  { %v3204_v5 = vpop.eup %3203 }
0x1702   :  { %v2339_v6 = vadd.f32 1.0, %v3204_v5 }
0x1704   :  { %3205 = vrcp.f32 %v2339_v6 }
0x170e   :  { %v3206_v7 = vpop.eup %3205 }
0x170f   :  { %v2343_v8 = vmul.f32 %v3206_v7, %v2083_v45 }
0x1772   :  { %v2346_v9 = vpop.permute.xlu0 %2345 }
0x1773   :  { %v2348_v11 = vmul.f32 %v3206_v7, %v2346_v9 }
0x1775   :  { %2350 = vrot.lane.b32.xlu1 %v2348_v11, %s3213_s23 }
0x17e7   :  { %v2351_v13 = vpop.permute.xlu1 %2350 }
0x17e8   :  { %v2353_v14 = vadd.f32 %v2351_v13, %v2343_v8 }
0x17ea   :  { %3207 = vtanh.f32 %v2353_v14 }
0x17f4   :  { %v3208_v19 = vpop.eup %3207 }
0x17f5   :  { %2356 = vrot.lane.b32.xlu0 %v3208_v19, %s3213_s23 }
0x1867   :  { %v2357_v20 = vpop.permute.xlu0 %2356 }
0x1868   :  { %v2359_v4 = vmul.f32 %v3206_v7, %v2357_v20 }
0x186a   :  { %2372 = vrot.lane.b32.xlu1 %v2359_v4, %s3214_s0 }
0x18dc   :  { %v2373_v10 = vpop.permute.xlu1 %2372 }
0x18dd   :  { %2924 = vmatmul.mubr.msk.f32.vlgmr.msra.gmra.mrb[30].mxu0 %vm195_vm3, %v2373_v10 }
0x19b0   :  { %v2442_v21 = vpop.f32.mrb[30].mxu0 }
0x19b1   :  { %v2443_v22 = vadd.f32 %v2501_v38, %v2442_v21  ;;  %v2925_v34 = vpop.f32.mrb[31].mxu0 }
0x19b3   :  { %2447 = vst.msk [vmem:[%s3715_s9] sm:$0xff] %vm2446_vm4, %v2443_v22 }

</bundles_post_ra>
